<compile_context>
chip_gen: v5e
topology: v5e:2x2
jax: 0.10.0
libtpu: 0.0.40
codegen_flags: <defaults>
</compile_context>

<pallas_src>
import jax
import jax.numpy as jnp
from jax import lax
from jax.experimental import pallas as pl
from jax.experimental.pallas import tpu as pltpu

TPAD = 128  # lane-dense padding of the classifier output / wcls columns


def _round8(v):
    return ((v + 7) // 8) * 8


# ----------------------------------------------------------------------------
# Raw (unpacked) parameters.
# ----------------------------------------------------------------------------
def init_params(key, *, C=64, patch=32, n=4, k_lin=4, T=11):
    P = patch * patch
    keys = jax.random.split(key, 9)
    s = 0.02
    params = dict(
        w_pe=jax.random.normal(keys[0], (P, C)) * s,          # encoder proxy
        b_pe=jnp.zeros((1, C)),
        pos_emb=jax.random.normal(keys[1], (n, C)),           # torch.randn(1, seq, dim)
        ln1_g=jnp.ones((1, C)), ln1_b=jnp.zeros((1, C)),      # nn.LayerNorm defaults
        wq=jax.random.normal(keys[2], (C, C)) * s,            # stored (in, out)
        wk=jax.random.normal(keys[3], (C, C)) * s,
        wv=jax.random.normal(keys[4], (C, C)) * s,
        ek=jax.random.normal(keys[5], (n, k_lin)) * s,        # Linformer proj_k
        ev=jax.random.normal(keys[6], (n, k_lin)) * s,        # Linformer proj_v
        wo=jax.random.normal(keys[7], (C, C)) * s,
        bo=jnp.zeros((1, C)),
        ln2_g=jnp.ones((1, C)), ln2_b=jnp.zeros((1, C)),
        wcls=jax.random.normal(keys[8], (C, T)) * s,
        bcls=jnp.zeros((1, T)),
    )
    return {k: v.astype(jnp.float32) for k, v in params.items()}


def im2col_patches(x, patch):
    # x: (B, Cin, H, W) NCHW -> (B * (H/p) * (W/p), Cin * p * p), image-major tokens
    B, Cin, H, W = x.shape
    ph, pw = H // patch, W // patch
    x = x.reshape(B, Cin, ph, patch, pw, patch)
    x = x.transpose(0, 2, 4, 1, 3, 5)                  # (B, ph, pw, Cin, p, p)
    return x.reshape(B * ph * pw, Cin * patch * patch)


# ----------------------------------------------------------------------------
# Host-side packing: one 8-row-aligned f32 slab holding every tiny/constant
# tensor (one DMA, constant across grid steps) + a few bf16 weight matrices.
# ----------------------------------------------------------------------------
def pack_params(params, *, batch_tile, heads):
    C = params["wq"].shape[0]
    n, k_lin = params["ek"].shape
    T = params["wcls"].shape[1]
    assert C % heads == 0
    d_h = C // heads
    Bt = batch_tile
    Bn, Bk, HBn = Bt * n, Bt * k_lin, heads * Bt * n
    assert 2 * C <= 128 and 2 * Bk <= 128 and Bn <= 128 and T <= TPAD

    # Slab row layout — every region starts on a multiple of 8 rows, lane 0.
    R_LN1, R_LN2, R_BO, R_BCLS = 0, 1, 2, 3
    R_POS = 8
    R_E = _round8(R_POS + Bn)
    R_HM = _round8(R_E + Bn)
    R_AB = _round8(R_HM + HBn)
    R_POOL = _round8(R_AB + HBn)
    rows = _round8(R_POOL + Bt)

    slab = jnp.zeros((rows, 128), jnp.float32)
    slab = slab.at[R_LN1, 0:C].set(params["ln1_g"].reshape(-1))
    slab = slab.at[R_LN1, C:2 * C].set(params["ln1_b"].reshape(-1))
    slab = slab.at[R_LN2, 0:C].set(params["ln2_g"].reshape(-1))
    slab = slab.at[R_LN2, C:2 * C].set(params["ln2_b"].reshape(-1))
    slab = slab.at[R_BO, 0:C].set(params["bo"].reshape(-1))
    slab = slab.at[R_BCLS, 0:T].set(params["bcls"].reshape(-1))

    # pos embedding tiled over the batch tile, patch-embed bias folded in
    pos_plus = jnp.tile(params["pos_emb"], (Bt, 1)) + params["b_pe"]
    slab = slab.at[R_POS:R_POS + Bn, 0:C].set(pos_plus)

    # Linformer sequence projections, block-diagonal over the batch tile,
    # stacked side-by-side: E_stack = [ kron(I,Ek) | kron(I,Ev) ]  (Bn, 2Bk)
    eye = jnp.eye(Bt, dtype=jnp.float32)
    slab = slab.at[R_E:R_E + Bn, 0:Bk].set(jnp.kron(eye, params["ek"]))
    slab = slab.at[R_E:R_E + Bn, Bk:2 * Bk].set(jnp.kron(eye, params["ev"]))

    # head mask: row block h carries 1.0 on the channel lanes of head h
    rh = jnp.arange(HBn)[:, None] // Bn
    ch = jnp.arange(C)[None, :] // d_h
    slab = slab.at[R_HM:R_HM + HBn, 0:C].set((rh == ch).astype(jnp.float32))

    # additive attention bias keeping batch elements inside a tile independent
    qb = (jnp.arange(HBn)[:, None] % Bn) // n
    kb = jnp.arange(Bk)[None, :] // k_lin
    slab = slab.at[R_AB:R_AB + HBn, 0:Bk].set(
        jnp.where(qb == kb, 0.0, -1e30).astype(jnp.float32))

    # token-mean pooling matrix (1/n is exact in bf16 for n a power of two)
    pb = jnp.arange(Bt)[:, None]
    tb = jnp.arange(Bn)[None, :] // n
    slab = slab.at[R_POOL:R_POOL + Bt, 0:Bn].set(
        jnp.where(pb == tb, 1.0 / n, 0.0).astype(jnp.float32))

    # q/k/v column blocks start at 128-lane boundaries; softmax scale folded into wq
    scale = float(d_h) ** -0.5
    wqkv = jnp.zeros((C, 3 * 128), jnp.float32)
    wqkv = wqkv.at[:, 0:C].set(params["wq"] * scale)
    wqkv = wqkv.at[:, 128:128 + C].set(params["wk"])
    wqkv = wqkv.at[:, 256:256 + C].set(params["wv"])
    wcls = jnp.zeros((C, TPAD), jnp.float32).at[:, 0:T].set(params["wcls"])

    layout = dict(R_LN1=R_LN1, R_LN2=R_LN2, R_BO=R_BO, R_BCLS=R_BCLS,
                  R_POS=R_POS, R_E=R_E, R_HM=R_HM, R_AB=R_AB, R_POOL=R_POOL)
    return dict(
        slab=slab,
        wpe=params["w_pe"].astype(jnp.bfloat16),
        wqkv=wqkv.astype(jnp.bfloat16),
        wo=params["wo"].astype(jnp.bfloat16),
        wcls=wcls.astype(jnp.bfloat16),
        layout=layout,
        dims=dict(batch_tile=Bt, n=n, C=C, k_lin=k_lin, T=T, heads=heads),
    )


# ----------------------------------------------------------------------------
# Fused kernel: patch-embed proxy + Attn + GAP + classification head,
# one batch tile per grid step.
# ----------------------------------------------------------------------------
def make_fused_kernel(*, Bt, n, C, heads, k_lin, layout):
    eps = 1e-5
    Bn, Bk, HBn = Bt * n, Bt * k_lin, heads * Bt * n
    L = layout
    bf16, f32 = jnp.bfloat16, jnp.float32

    def kernel(patch_ref, wpe_ref, wqkv_ref, wo_ref, wcls_ref, slab_ref, out_ref):
        # ---- constants / tiny params: static row slices of the packed slab ----
        ln1_g = slab_ref[L["R_LN1"]:L["R_LN1"] + 1, 0:C]
        ln1_b = slab_ref[L["R_LN1"]:L["R_LN1"] + 1, C:2 * C]
        ln2_g = slab_ref[L["R_LN2"]:L["R_LN2"] + 1, 0:C]
        ln2_b = slab_ref[L["R_LN2"]:L["R_LN2"] + 1, C:2 * C]
        bo = slab_ref[L["R_BO"]:L["R_BO"] + 1, 0:C]
        bcls = slab_ref[L["R_BCLS"]:L["R_BCLS"] + 1, :]                  # (1, TPAD)
        pos_plus = slab_ref[L["R_POS"]:L["R_POS"] + Bn, 0:C]             # (Bn, C)
        e_stack = slab_ref[L["R_E"]:L["R_E"] + Bn, 0:2 * Bk]             # (Bn, 2Bk)
        head_mask = slab_ref[L["R_HM"]:L["R_HM"] + HBn, 0:C]             # (HBn, C)
        attn_bias = slab_ref[L["R_AB"]:L["R_AB"] + HBn, 0:Bk]            # (HBn, Bk)
        pool = slab_ref[L["R_POOL"]:L["R_POOL"] + Bt, 0:Bn]              # (Bt, Bn)

        # ---- encoder proxy: stride-32 patch embedding + (bias + pos emb) ----
        feats = jnp.dot(patch_ref[...], wpe_ref[...],
                        preferred_element_type=f32)                      # (Bn, C)
        x = feats + pos_plus

        # ---- pre-attention LayerNorm -> ReLU (Dropout = identity in eval) ----
        mu = jnp.mean(x, axis=-1, keepdims=True)
        var = jnp.mean(jnp.square(x - mu), axis=-1, keepdims=True)
        xr = jnp.maximum((x - mu) * lax.rsqrt(var + eps) * ln1_g + ln1_b, 0.0)

        # ---- q/k/v in one matmul (softmax scale pre-folded into wq) ----
        qkv = jnp.dot(xr.astype(bf16), wqkv_ref[...],
                      preferred_element_type=f32)                        # (Bn, 384)
        q = qkv[:, 0:C]

        # ---- Linformer sequence projections for k AND v in one matmul ----
        dn0 = (((0,), (0,)), ((), ()))          # contract the token (row) dim
        p = lax.dot_general(e_stack.astype(bf16), qkv.astype(bf16), dn0,
                            preferred_element_type=f32)                  # (2Bk, 384)
        kp = p[0:Bk, 128:128 + C]               # Ek^T @ k   (lane-aligned block)
        vp = p[Bk:2 * Bk, 256:256 + C]          # Ev^T @ v   (lane-aligned block)

        # ---- all heads & batches in one score matmul (head-masked row expansion) ----
        q_exp = jnp.concatenate([q] * heads, axis=0) * head_mask         # (HBn, C)
        dn1 = (((1,), (1,)), ((), ()))          # contract the channel (lane) dim
        dots = lax.dot_general(q_exp.astype(bf16), kp.astype(bf16), dn1,
                               preferred_element_type=f32) + attn_bias   # (HBn, Bk)
        dots = dots - jnp.max(dots, axis=-1, keepdims=True)
        e = jnp.exp(dots)
        attn = e * pl.reciprocal(jnp.sum(e, axis=-1, keepdims=True), approx=True)

        ctx = jnp.dot(attn.astype(bf16), vp.astype(bf16),
                      preferred_element_type=f32) * head_mask            # (HBn, C)
        # "concat heads": row block h only carries head-h lanes -> sum the blocks
        heads_cat = ctx[0:Bn, :]
        for h in range(1, heads):                                        # static adds
            heads_cat = heads_cat + ctx[h * Bn:(h + 1) * Bn, :]

        # ---- to_out projection + residual (attn(x) + x) ----
        y = jnp.dot(heads_cat.astype(bf16), wo_ref[...],
                    preferred_element_type=f32) + bo + x                 # (Bn, C)

        # ---- last_features.mean(dim=(2,3)) == per-image token mean ----
        g = jnp.dot(pool.astype(bf16), y.astype(bf16),
                    preferred_element_type=f32)                          # (Bt, C)

        # ---- classification head: LayerNorm -> ReLU -> Dropout(id) -> Linear ----
        mu2 = jnp.mean(g, axis=-1, keepdims=True)
        var2 = jnp.mean(jnp.square(g - mu2), axis=-1, keepdims=True)
        gr = jnp.maximum((g - mu2) * lax.rsqrt(var2 + eps) * ln2_g + ln2_b, 0.0)
        out_ref[...] = jnp.dot(gr.astype(bf16), wcls_ref[...],
                               preferred_element_type=f32) + bcls        # (Bt, TPAD)

    return kernel


# ----------------------------------------------------------------------------
# Wrapper: im2col + bf16 cast + pallas_call + seg zeros all inside one jit.
# ----------------------------------------------------------------------------
def build_forward(packed, *, patch=32, materialize_seg=True):
    d, L = packed["dims"], packed["layout"]
    Bt, n, C, k_lin, heads, T = (d["batch_tile"], d["n"], d["C"],
                                 d["k_lin"], d["heads"], d["T"])
    Bn_t = Bt * n
    kernel = make_fused_kernel(Bt=Bt, n=n, C=C, heads=heads, k_lin=k_lin, layout=L)
    weights = (packed["wpe"], packed["wqkv"], packed["wo"],
               packed["wcls"], packed["slab"])

    @jax.jit
    def forward(x, wpe, wqkv, wo, wcls, slab):
        B, RES = x.shape[0], x.shape[-1]
        assert B % Bt == 0, "batch must be a multiple of the batch tile"
        patches = im2col_patches(x, patch).astype(jnp.bfloat16)   # (B*n, P) bf16
        P = patches.shape[1]
        n_tiles = B // Bt

        def cspec(a):                                     # weights: VMEM-resident
            return pl.BlockSpec(a.shape, lambda i: (0, 0))

        out_pad = pl.pallas_call(
            kernel,
            out_shape=jax.ShapeDtypeStruct((B, TPAD), jnp.float32),
            grid=(n_tiles,),
            in_specs=[pl.BlockSpec((Bn_t, P), lambda i: (i, 0)),   # streamed patches
                      cspec(wpe), cspec(wqkv), cspec(wo), cspec(wcls), cspec(slab)],
            out_specs=pl.BlockSpec((Bt, TPAD), lambda i: (i, 0)),  # lane-dense, 8 rows
            compiler_params=pltpu.CompilerParams(
                dimension_semantics=("parallel",)),   # shard batch tiles over TCs (v7x)
        )(patches, wpe, wqkv, wo, wcls, slab)
        cls_pred = out_pad[:, 0:T]                                     # (B, 11)

        # Module returns torch.zeros(B, 11, RES, RES) — pure unused HBM traffic,
        # only materialized on request.
        seg_pred = (jnp.zeros((B, 11, RES, RES), jnp.float32)
                    if materialize_seg else None)
        return cls_pred, seg_pred

    return lambda x: forward(x, *weights) + (None,)   # supcon_feats = None


# ----------------------------------------------------------------------------
# Pure-JAX f32 reference (same math, torch-style layout) for a tolerance check.
# ----------------------------------------------------------------------------
def reference_forward(x, params, *, heads, patch=32):
    B = x.shape[0]
    C = params["wq"].shape[0]
    n, k_lin = params["ek"].shape
    d_h = C // heads
    eps = 1e-5

    def ln(v, g, b):
        mu = v.mean(-1, keepdims=True)
        var = ((v - mu) ** 2).mean(-1, keepdims=True)
        return (v - mu) / jnp.sqrt(var + eps) * g.reshape(-1) + b.reshape(-1)

    patches = im2col_patches(x, patch)
    feats = patches @ params["w_pe"] + params["b_pe"]
    xs = feats.reshape(B, n, C) + params["pos_emb"][None]
    xr = jnp.maximum(ln(xs, params["ln1_g"], params["ln1_b"]), 0.0)
    q = xr @ params["wq"]
    kk = xr @ params["wk"]
    vv = xr @ params["wv"]
    kp = jnp.einsum("bnd,nk->bkd", kk, params["ek"])
    vp = jnp.einsum("bnd,nk->bkd", vv, params["ev"])
    qh = q.reshape(B, n, heads, d_h).transpose(0, 2, 1, 3)
    kh = kp.reshape(B, k_lin, heads, d_h).transpose(0, 2, 1, 3)
    vh = vp.reshape(B, k_lin, heads, d_h).transpose(0, 2, 1, 3)
    dots = jnp.einsum("bhnd,bhkd->bhnk", qh, kh) * (d_h ** -0.5)
    attn = jax.nn.softmax(dots, axis=-1)
    o = jnp.einsum("bhnk,bhkd->bhnd", attn, vh).transpose(0, 2, 1, 3).reshape(B, n, C)
    y = o @ params["wo"] + params["bo"] + xs
    g = y.mean(axis=1)
    gr = jnp.maximum(ln(g, params["ln2_g"], params["ln2_b"]), 0.0)
    return gr @ params["wcls"] + params["bcls"]


if __name__ == "__main__":
    key = jax.random.PRNGKey(0)
    kx, kparams = jax.random.split(key)
    B, RES, BT, HEADS = 16, 64, 8, 4      # resolution=64 -> 2x2 map, seq_len=4
    x = jax.random.normal(kx, (B, 1, RES, RES), jnp.float32)
    params = init_params(kparams, C=64, patch=32, n=(RES // 32) ** 2, k_lin=4, T=11)
    packed = pack_params(params, batch_tile=BT, heads=HEADS)

    fwd = build_forward(packed, patch=32, materialize_seg=True)
    cls_pred, seg_pred, supcon_feats = fwd(x)
    jax.block_until_ready(cls_pred)
    jax.block_until_ready(seg_pred)

    assert cls_pred.shape == (B, 11)
    assert seg_pred.shape == (B, 11, RES, RES)
    assert supcon_feats is None
    assert bool(jnp.all(jnp.isfinite(cls_pred)))

    # loose tolerance vs. f32 reference (bf16 MXU operands + approx reciprocal)
    ref = reference_forward(x, params, heads=HEADS)
    err = float(jnp.max(jnp.abs(cls_pred - ref)))
    assert err < 0.05, f"kernel deviates from f32 reference: max abs err {err}"

    print("KERNEL_OK")
</pallas_src>

<mosaic_0001>
module attributes {stable_mosaic.version = 11 : i64} {
  func.func @kernel(%arg0: i32, %arg1: memref<32x1024xbf16, #tpu.memory_space<vmem>>, %arg2: memref<1024x64xbf16, #tpu.memory_space<vmem>>, %arg3: memref<64x384xbf16, #tpu.memory_space<vmem>>, %arg4: memref<64x64xbf16, #tpu.memory_space<vmem>>, %arg5: memref<64x128xbf16, #tpu.memory_space<vmem>>, %arg6: memref<336x128xf32, #tpu.memory_space<vmem>>, %arg7: memref<8x128xf32, #tpu.memory_space<vmem>>) attributes {dimension_semantics = [#tpu.dimension_semantics<parallel>], iteration_bounds = array<i64: 2>, scalar_prefetch = 0 : i64, scratch_operands = 0 : i64, tpu.core_type = #tpu.core_type<tc>, window_params = [{transform_indices = @transform_0, window_bounds = array<i64: 32, 1024>}, {pipeline_mode = #tpu.pipeline_mode<synchronous>, transform_indices = @transform_1, window_bounds = array<i64: 1024, 64>}, {pipeline_mode = #tpu.pipeline_mode<synchronous>, transform_indices = @transform_2, window_bounds = array<i64: 64, 384>}, {pipeline_mode = #tpu.pipeline_mode<synchronous>, transform_indices = @transform_3, window_bounds = array<i64: 64, 64>}, {pipeline_mode = #tpu.pipeline_mode<synchronous>, transform_indices = @transform_4, window_bounds = array<i64: 64, 128>}, {pipeline_mode = #tpu.pipeline_mode<synchronous>, transform_indices = @transform_5, window_bounds = array<i64: 336, 128>}, {transform_indices = @transform_6, window_bounds = array<i64: 8, 128>}]} {
    %c0 = arith.constant 0 : index
    %c0_0 = arith.constant 0 : index
    %0 = vector.load %arg6[%c0, %c0_0] : memref<336x128xf32, #tpu.memory_space<vmem>>, vector<1x64xf32>
    %c0_1 = arith.constant 0 : index
    %c64 = arith.constant 64 : index
    %1 = vector.load %arg6[%c0_1, %c64] : memref<336x128xf32, #tpu.memory_space<vmem>>, vector<1x64xf32>
    %c1 = arith.constant 1 : index
    %c0_2 = arith.constant 0 : index
    %2 = vector.load %arg6[%c1, %c0_2] : memref<336x128xf32, #tpu.memory_space<vmem>>, vector<1x64xf32>
    %c1_3 = arith.constant 1 : index
    %c64_4 = arith.constant 64 : index
    %3 = vector.load %arg6[%c1_3, %c64_4] : memref<336x128xf32, #tpu.memory_space<vmem>>, vector<1x64xf32>
    %c2 = arith.constant 2 : index
    %c0_5 = arith.constant 0 : index
    %4 = vector.load %arg6[%c2, %c0_5] : memref<336x128xf32, #tpu.memory_space<vmem>>, vector<1x64xf32>
    %c3 = arith.constant 3 : index
    %c0_6 = arith.constant 0 : index
    %5 = vector.load %arg6[%c3, %c0_6] : memref<336x128xf32, #tpu.memory_space<vmem>>, vector<1x128xf32>
    %c8 = arith.constant 8 : index
    %c0_7 = arith.constant 0 : index
    %6 = vector.load %arg6[%c8, %c0_7] : memref<336x128xf32, #tpu.memory_space<vmem>>, vector<32x64xf32>
    %c40 = arith.constant 40 : index
    %c0_8 = arith.constant 0 : index
    %7 = vector.load %arg6[%c40, %c0_8] : memref<336x128xf32, #tpu.memory_space<vmem>>, vector<32x64xf32>
    %c72 = arith.constant 72 : index
    %c0_9 = arith.constant 0 : index
    %8 = vector.load %arg6[%c72, %c0_9] : memref<336x128xf32, #tpu.memory_space<vmem>>, vector<128x64xf32>
    %c200 = arith.constant 200 : index
    %c0_10 = arith.constant 0 : index
    %9 = vector.load %arg6[%c200, %c0_10] : memref<336x128xf32, #tpu.memory_space<vmem>>, vector<128x32xf32>
    %c328 = arith.constant 328 : index
    %c0_11 = arith.constant 0 : index
    %10 = vector.load %arg6[%c328, %c0_11] : memref<336x128xf32, #tpu.memory_space<vmem>>, vector<8x32xf32>
    %c0_12 = arith.constant 0 : index
    %c0_13 = arith.constant 0 : index
    %11 = vector.load %arg1[%c0_12, %c0_13] : memref<32x1024xbf16, #tpu.memory_space<vmem>>, vector<32x1024xbf16>
    %c0_14 = arith.constant 0 : index
    %c0_15 = arith.constant 0 : index
    %12 = vector.load %arg2[%c0_14, %c0_15] : memref<1024x64xbf16, #tpu.memory_space<vmem>>, vector<1024x64xbf16>
    %cst = arith.constant dense<0.000000e+00> : vector<32x64xf32>
    %13 = tpu.matmul %11, %12, %cst {dimension_numbers = #tpu.dot_dimension_numbers<[1], [0], [0], [1], [0, 0, 1, 1], [], []>} : vector<32x1024xbf16>, vector<1024x64xbf16>, vector<32x64xf32> -> vector<32x64xf32>
    %14 = arith.addf %13, %6 : vector<32x64xf32>
    %cst_16 = arith.constant dense<0.000000e+00> : vector<32xf32>
    %15 = vector.multi_reduction <add>, %14, %cst_16 [1] : vector<32x64xf32> to vector<32xf32>
    %16 = vector.shape_cast %15 : vector<32xf32> to vector<32x1xf32>
    %cst_17 = arith.constant 6.400000e+01 : f32
    %17 = vector.broadcast %cst_17 : f32 to vector<32x1xf32>
    %18 = arith.divf %16, %17 : vector<32x1xf32>
    %19 = vector.broadcast %18 : vector<32x1xf32> to vector<32x64xf32>
    %20 = arith.subf %14, %19 : vector<32x64xf32>
    %21 = arith.mulf %20, %20 : vector<32x64xf32>
    %cst_18 = arith.constant dense<0.000000e+00> : vector<32xf32>
    %22 = vector.multi_reduction <add>, %21, %cst_18 [1] : vector<32x64xf32> to vector<32xf32>
    %23 = vector.shape_cast %22 : vector<32xf32> to vector<32x1xf32>
    %cst_19 = arith.constant 6.400000e+01 : f32
    %24 = vector.broadcast %cst_19 : f32 to vector<32x1xf32>
    %25 = arith.divf %23, %24 : vector<32x1xf32>
    %26 = vector.broadcast %18 : vector<32x1xf32> to vector<32x64xf32>
    %27 = arith.subf %14, %26 : vector<32x64xf32>
    %cst_20 = arith.constant 9.99999974E-6 : f32
    %28 = vector.broadcast %cst_20 : f32 to vector<32x1xf32>
    %29 = arith.addf %25, %28 : vector<32x1xf32>
    %30 = math.rsqrt %29 : vector<32x1xf32>
    %31 = vector.broadcast %30 : vector<32x1xf32> to vector<32x64xf32>
    %32 = arith.mulf %27, %31 : vector<32x64xf32>
    %33 = vector.broadcast %0 : vector<1x64xf32> to vector<32x64xf32>
    %34 = arith.mulf %32, %33 : vector<32x64xf32>
    %35 = vector.broadcast %1 : vector<1x64xf32> to vector<32x64xf32>
    %36 = arith.addf %34, %35 : vector<32x64xf32>
    %cst_21 = arith.constant 0.000000e+00 : f32
    %37 = vector.broadcast %cst_21 : f32 to vector<32x64xf32>
    %38 = arith.maximumf %36, %37 : vector<32x64xf32>
    %39 = arith.truncf %38 : vector<32x64xf32> to vector<32x64xbf16>
    %c0_22 = arith.constant 0 : index
    %c0_23 = arith.constant 0 : index
    %40 = vector.load %arg3[%c0_22, %c0_23] : memref<64x384xbf16, #tpu.memory_space<vmem>>, vector<64x384xbf16>
    %cst_24 = arith.constant dense<0.000000e+00> : vector<32x384xf32>
    %41 = tpu.matmul %39, %40, %cst_24 {dimension_numbers = #tpu.dot_dimension_numbers<[1], [0], [0], [1], [0, 0, 1, 1], [], []>} : vector<32x64xbf16>, vector<64x384xbf16>, vector<32x384xf32> -> vector<32x384xf32>
    %42 = vector.extract_strided_slice %41 {offsets = [0, 0], sizes = [32, 64], strides = [1, 1]} : vector<32x384xf32> to vector<32x64xf32>
    %43 = arith.truncf %7 : vector<32x64xf32> to vector<32x64xbf16>
    %44 = arith.truncf %41 : vector<32x384xf32> to vector<32x384xbf16>
    %cst_25 = arith.constant dense<0.000000e+00> : vector<64x384xf32>
    %45 = tpu.matmul %43, %44, %cst_25 {dimension_numbers = #tpu.dot_dimension_numbers<[0], [0], [1], [1], [0, 1, 1, 1], [], []>} : vector<32x64xbf16>, vector<32x384xbf16>, vector<64x384xf32> -> vector<64x384xf32>
    %46 = vector.extract_strided_slice %45 {offsets = [0, 128], sizes = [32, 64], strides = [1, 1]} : vector<64x384xf32> to vector<32x64xf32>
    %47 = vector.extract_strided_slice %45 {offsets = [32, 256], sizes = [32, 64], strides = [1, 1]} : vector<64x384xf32> to vector<32x64xf32>
    %48 = tpu.concatenate %42, %42, %42, %42 in 0 : vector<32x64xf32>, vector<32x64xf32>, vector<32x64xf32>, vector<32x64xf32> -> vector<128x64xf32>
    %49 = arith.mulf %48, %8 : vector<128x64xf32>
    %50 = arith.truncf %49 : vector<128x64xf32> to vector<128x64xbf16>
    %51 = arith.truncf %46 : vector<32x64xf32> to vector<32x64xbf16>
    %cst_26 = arith.constant dense<0.000000e+00> : vector<128x32xf32>
    %52 = tpu.matmul %50, %51, %cst_26 {dimension_numbers = #tpu.dot_dimension_numbers<[1], [1], [0], [0], [0, 0, 1, 0], [], []>} : vector<128x64xbf16>, vector<32x64xbf16>, vector<128x32xf32> -> vector<128x32xf32>
    %53 = arith.addf %52, %9 : vector<128x32xf32>
    %cst_27 = arith.constant dense<0xFF800000> : vector<128xf32>
    %54 = vector.multi_reduction <maximumf>, %53, %cst_27 [1] : vector<128x32xf32> to vector<128xf32>
    %55 = vector.shape_cast %54 : vector<128xf32> to vector<128x1xf32>
    %56 = vector.broadcast %55 : vector<128x1xf32> to vector<128x32xf32>
    %57 = arith.subf %53, %56 : vector<128x32xf32>
    %58 = math.exp %57 : vector<128x32xf32>
    %cst_28 = arith.constant dense<0.000000e+00> : vector<128xf32>
    %59 = vector.multi_reduction <add>, %58, %cst_28 [1] : vector<128x32xf32> to vector<128xf32>
    %60 = vector.shape_cast %59 : vector<128xf32> to vector<128x1xf32>
    %61 = tpu.reciprocal %60 {approx = true} : vector<128x1xf32> -> vector<128x1xf32>
    %62 = vector.broadcast %61 : vector<128x1xf32> to vector<128x32xf32>
    %63 = arith.mulf %58, %62 : vector<128x32xf32>
    %64 = arith.truncf %63 : vector<128x32xf32> to vector<128x32xbf16>
    %65 = arith.truncf %47 : vector<32x64xf32> to vector<32x64xbf16>
    %cst_29 = arith.constant dense<0.000000e+00> : vector<128x64xf32>
    %66 = tpu.matmul %64, %65, %cst_29 {dimension_numbers = #tpu.dot_dimension_numbers<[1], [0], [0], [1], [0, 0, 1, 1], [], []>} : vector<128x32xbf16>, vector<32x64xbf16>, vector<128x64xf32> -> vector<128x64xf32>
    %67 = arith.mulf %66, %8 : vector<128x64xf32>
    %68 = vector.extract_strided_slice %67 {offsets = [0, 0], sizes = [32, 64], strides = [1, 1]} : vector<128x64xf32> to vector<32x64xf32>
    %69 = vector.extract_strided_slice %67 {offsets = [32, 0], sizes = [32, 64], strides = [1, 1]} : vector<128x64xf32> to vector<32x64xf32>
    %70 = arith.addf %68, %69 : vector<32x64xf32>
    %71 = vector.extract_strided_slice %67 {offsets = [64, 0], sizes = [32, 64], strides = [1, 1]} : vector<128x64xf32> to vector<32x64xf32>
    %72 = arith.addf %70, %71 : vector<32x64xf32>
    %73 = vector.extract_strided_slice %67 {offsets = [96, 0], sizes = [32, 64], strides = [1, 1]} : vector<128x64xf32> to vector<32x64xf32>
    %74 = arith.addf %72, %73 : vector<32x64xf32>
    %75 = arith.truncf %74 : vector<32x64xf32> to vector<32x64xbf16>
    %c0_30 = arith.constant 0 : index
    %c0_31 = arith.constant 0 : index
    %76 = vector.load %arg4[%c0_30, %c0_31] : memref<64x64xbf16, #tpu.memory_space<vmem>>, vector<64x64xbf16>
    %cst_32 = arith.constant dense<0.000000e+00> : vector<32x64xf32>
    %77 = tpu.matmul %75, %76, %cst_32 {dimension_numbers = #tpu.dot_dimension_numbers<[1], [0], [0], [1], [0, 0, 1, 1], [], []>} : vector<32x64xbf16>, vector<64x64xbf16>, vector<32x64xf32> -> vector<32x64xf32>
    %78 = vector.broadcast %4 : vector<1x64xf32> to vector<32x64xf32>
    %79 = arith.addf %77, %78 : vector<32x64xf32>
    %80 = arith.addf %79, %14 : vector<32x64xf32>
    %81 = arith.truncf %10 : vector<8x32xf32> to vector<8x32xbf16>
    %82 = arith.truncf %80 : vector<32x64xf32> to vector<32x64xbf16>
    %cst_33 = arith.constant dense<0.000000e+00> : vector<8x64xf32>
    %83 = tpu.matmul %81, %82, %cst_33 {dimension_numbers = #tpu.dot_dimension_numbers<[1], [0], [0], [1], [0, 0, 1, 1], [], []>} : vector<8x32xbf16>, vector<32x64xbf16>, vector<8x64xf32> -> vector<8x64xf32>
    %cst_34 = arith.constant dense<0.000000e+00> : vector<8xf32>
    %84 = vector.multi_reduction <add>, %83, %cst_34 [1] : vector<8x64xf32> to vector<8xf32>
    %85 = vector.shape_cast %84 : vector<8xf32> to vector<8x1xf32>
    %cst_35 = arith.constant 6.400000e+01 : f32
    %86 = vector.broadcast %cst_35 : f32 to vector<8x1xf32>
    %87 = arith.divf %85, %86 : vector<8x1xf32>
    %88 = vector.broadcast %87 : vector<8x1xf32> to vector<8x64xf32>
    %89 = arith.subf %83, %88 : vector<8x64xf32>
    %90 = arith.mulf %89, %89 : vector<8x64xf32>
    %cst_36 = arith.constant dense<0.000000e+00> : vector<8xf32>
    %91 = vector.multi_reduction <add>, %90, %cst_36 [1] : vector<8x64xf32> to vector<8xf32>
    %92 = vector.shape_cast %91 : vector<8xf32> to vector<8x1xf32>
    %cst_37 = arith.constant 6.400000e+01 : f32
    %93 = vector.broadcast %cst_37 : f32 to vector<8x1xf32>
    %94 = arith.divf %92, %93 : vector<8x1xf32>
    %95 = vector.broadcast %87 : vector<8x1xf32> to vector<8x64xf32>
    %96 = arith.subf %83, %95 : vector<8x64xf32>
    %cst_38 = arith.constant 9.99999974E-6 : f32
    %97 = vector.broadcast %cst_38 : f32 to vector<8x1xf32>
    %98 = arith.addf %94, %97 : vector<8x1xf32>
    %99 = math.rsqrt %98 : vector<8x1xf32>
    %100 = vector.broadcast %99 : vector<8x1xf32> to vector<8x64xf32>
    %101 = arith.mulf %96, %100 : vector<8x64xf32>
    %102 = vector.broadcast %2 : vector<1x64xf32> to vector<8x64xf32>
    %103 = arith.mulf %101, %102 : vector<8x64xf32>
    %104 = vector.broadcast %3 : vector<1x64xf32> to vector<8x64xf32>
    %105 = arith.addf %103, %104 : vector<8x64xf32>
    %cst_39 = arith.constant 0.000000e+00 : f32
    %106 = vector.broadcast %cst_39 : f32 to vector<8x64xf32>
    %107 = arith.maximumf %105, %106 : vector<8x64xf32>
    %108 = arith.truncf %107 : vector<8x64xf32> to vector<8x64xbf16>
    %c0_40 = arith.constant 0 : index
    %c0_41 = arith.constant 0 : index
    %109 = vector.load %arg5[%c0_40, %c0_41] : memref<64x128xbf16, #tpu.memory_space<vmem>>, vector<64x128xbf16>
    %cst_42 = arith.constant dense<0.000000e+00> : vector<8x128xf32>
    %110 = tpu.matmul %108, %109, %cst_42 {dimension_numbers = #tpu.dot_dimension_numbers<[1], [0], [0], [1], [0, 0, 1, 1], [], []>} : vector<8x64xbf16>, vector<64x128xbf16>, vector<8x128xf32> -> vector<8x128xf32>
    %111 = vector.broadcast %5 : vector<1x128xf32> to vector<8x128xf32>
    %112 = arith.addf %110, %111 : vector<8x128xf32>
    %c0_43 = arith.constant 0 : index
    %c0_44 = arith.constant 0 : index
    %113 = vector.load %arg7[%c0_43, %c0_44] : memref<8x128xf32, #tpu.memory_space<vmem>>, vector<8x128xf32>
    tpu.vector_store %arg7[%c0_43, %c0_44], %112 {strides = array<i32>} : memref<8x128xf32, #tpu.memory_space<vmem>>, vector<8x128xf32>,
    return
  }
  func.func @transform_0(%arg0: i32) -> (i32, i32) {
    %c0_i32 = arith.constant 0 : i32
    %c0_i32_0 = arith.constant 0 : i32
    return %arg0, %c0_i32 : i32, i32
  }
  func.func @transform_1(%arg0: i32) -> (i32, i32) {
    %c0_i32 = arith.constant 0 : i32
    %c0_i32_0 = arith.constant 0 : i32
    %c0_i32_1 = arith.constant 0 : i32
    return %c0_i32, %c0_i32_0 : i32, i32
  }
  func.func @transform_2(%arg0: i32) -> (i32, i32) {
    %c0_i32 = arith.constant 0 : i32
    %c0_i32_0 = arith.constant 0 : i32
    %c0_i32_1 = arith.constant 0 : i32
    return %c0_i32, %c0_i32_0 : i32, i32
  }
  func.func @transform_3(%arg0: i32) -> (i32, i32) {
    %c0_i32 = arith.constant 0 : i32
    %c0_i32_0 = arith.constant 0 : i32
    %c0_i32_1 = arith.constant 0 : i32
    return %c0_i32, %c0_i32_0 : i32, i32
  }
  func.func @transform_4(%arg0: i32) -> (i32, i32) {
    %c0_i32 = arith.constant 0 : i32
    %c0_i32_0 = arith.constant 0 : i32
    %c0_i32_1 = arith.constant 0 : i32
    return %c0_i32, %c0_i32_0 : i32, i32
  }
  func.func @transform_5(%arg0: i32) -> (i32, i32) {
    %c0_i32 = arith.constant 0 : i32
    %c0_i32_0 = arith.constant 0 : i32
    %c0_i32_1 = arith.constant 0 : i32
    return %c0_i32, %c0_i32_0 : i32, i32
  }
  func.func @transform_6(%arg0: i32) -> (i32, i32) {
    %c0_i32 = arith.constant 0 : i32
    %c0_i32_0 = arith.constant 0 : i32
    return %arg0, %c0_i32 : i32, i32
  }
}

</mosaic_0001>

<bundles_post_ra>
// kernel: forward.1
= control target key start
LH: loop header
LB: loop body
LE: loop exit
PB: predicated region body
PF: predicated region fallthrough
CT: control target
= control target key end

     0   :  { %s3782_s0 = inlined_call_operand.vmem [shape: bf16[64,1024], index: 0, kind: input, shape index: {}]   ;;  %s3783_s1 = inlined_call_operand.vmem [shape: bf16[1024,64], index: 1, kind: input, shape index: {}]   ;;  %s3784_s2 = inlined_call_operand.hbm [shape: bf16[64,384], index: 2, kind: input, shape index: {}]   ;;  %s3785_s3 = inlined_call_operand.hbm [shape: bf16[64,64], index: 3, kind: input, shape index: {}]   ;;  %s3786_s4 = inlined_call_operand.hbm [shape: bf16[64,128], index: 4, kind: input, shape index: {}]   ;;  %s3787_s5 = inlined_call_operand.hbm [shape: f32[336,128], index: 5, kind: input, shape index: {}]   ;;  %s3788_s6 = inlined_call_operand.hbm [shape: f32[16,128], index: 6, kind: output, shape index: {}]  }
   0x1   :  { %3790 = sst [smem:[#allocation17_spill]] %s3784_s2 }
   0x2   :  { %3791 = sst [smem:[#allocation18_spill]] %s3785_s3 }
   0x3   :  { %11 = vsyncpa [#allocation3], 0 }
   0x4   :  { %12 = vsyncpa [#allocation6], 0 }
   0x5   :  { %13 = vsyncpa [#allocation9], 0 }
   0x6   :  { %14 = vsyncpa [#allocation4], 0 }
   0x7   :  { %16 = vsyncpa [#allocation4 + $0x1], 0  ;;  %s3110_s21 = smov 0   ;;  %s3112_s22 = smov 0  }
   0x8   :  { %s3114_s23 = smov 0   ;;  %s3116_s24 = smov 0  }
   0x9 LB: > { %3792 = sst [smem:[#allocation15_spill]] %s3057_s23  ;;  %s3131_s25 = sadd.s32 4294967295, %s3061_s24   ;;  %s3061_s24 = sphi %s3116_s24, %s3804_s24   ;;  %s3057_s23 = sphi %s3114_s23, %s3801_s23   ;;  %s3053_s22 = sphi %s3112_s22, %s3803_s22   ;;  %s3049_s21 = sphi %s3110_s21, %s3802_s21  }
   0xa   : > { %s2143_s26 = sadd.s32 4294967294, %s3061_s24   ;;  %s3135_s27 = sadd.s32 1, %s3061_s24  }
   0xb   : > { %s160_s28 = sadd.s32 1, %s3057_s23  ;;  %s157_s29 = ssub.s32 %s3061_s24, %s3135_s27 }
   0xc   : > { %p170_p0 = scmp.ne.s32.totalorder %s3057_s23, %s3053_s22  ;;  %p158_p1 = scmp.eq.s32.totalorder %s157_s29, 0 }
   0xd   : > { %p171_p2 = scmp.eq.s32.totalorder %s3131_s25, 1  ;;  %p176_p3 = scmp.ne.s32.totalorder %s3053_s22, %s3049_s21 }
   0xe   : > { %p177_p4 = scmp.eq.s32.totalorder %s2143_s26, 1  ;;  %p2144_p7 = scmp.ge.s32.totalorder %s3061_s24, 1 }
   0xf   : > { %s3146_s30 = scalar_select %p158_p1, %s3057_s23, %s160_s28  }
  0x10   : > { %p3148_p5 = por %p171_p2, %p170_p0  ;;  %p3152_p6 = por %p177_p4, %p176_p3 }
  0x11   : > { %3793 = sst [smem:[#allocation16_spill]] %s3146_s30  ;;  %p184_p8 = scmp.lt.s32.totalorder %s3061_s24, 3 }
  0x12   : > { %p2733_p9 = scmp.eq.s32.totalorder %s3131_s25, 0  ;;  %s3797_s3 = sld [smem:[#allocation18_spill]] }
  0x13   : > { %p3159_p10 = pnand %p2144_p7, %p184_p8  ;;  %s3063_s13 = smov [#allocation5]  }
  0x14   : > { %s214_s14 = sshll.u32 %s3063_s13, 4  ;;  %s3799_s2 = sld [smem:[#allocation17_spill]]  ;;  %s215_s14 = int_to_ptr.vmem [resolvable:$true] %s214_s14 }
  0x15   : > { %p2716_p11 = pneg %p3159_p10  ;;  %s3064_s19 = smov 64  }
  0x16   : > { %s3065_s20 = smov 4   ;;  %s3066_s26 = smov [#allocation2]  }
  0x17   : > { %p3170_p12 = pnand %p2733_p9, %p2716_p11  ;;  %s200_s28 = sshll.u32 %s3066_s26, 4  ;;  %s201_s28 = int_to_ptr.vmem [resolvable:$true] %s200_s28 }
  0x18   : > { %s212_s12 = sshll.u32 %s3797_s3, 4  ;;  %s3067_s29 = smov 192   ;;  %s213_s12 = int_to_ptr.hbm [resolvable:$true] %s212_s12 }
  0x19   : > { %2722 = dma.hbm_to_vmem [thread:$0]  (!%p3170_p12), %s213_s12, 512, %s215_s14, [#allocation6], %s3064_s19, %s3064_s19, %s3065_s20  }
  0x1a   : > { %s198_s18 = sshll.u32 %s3799_s2, 4  ;;  %s3068_s10 = smov 12   ;;  %s199_s18 = int_to_ptr.hbm [resolvable:$true] %s198_s18 }
  0x1b   : > { %2719 = dma.hbm_to_vmem [thread:$0]  (!%p3170_p12), %s199_s18, 1536, %s201_s28, [#allocation3], %s3067_s29, %s3067_s29, %s3068_s10  }
  0x1c   : > { %s226_s16 = sshll.u32 %s3786_s4, 4  ;;  %s3069_s17 = smov [#allocation7]   ;;  %s227_s16 = int_to_ptr.hbm [resolvable:$true] %s226_s16 }
  0x1d   : > { %s228_s2 = sshll.u32 %s3069_s17, 4  ;;  %s240_s12 = sshll.u32 %s3787_s5, 4  ;;  %s229_s2 = int_to_ptr.vmem [resolvable:$true] %s228_s2  ;;  %s241_s12 = int_to_ptr.hbm [resolvable:$true] %s240_s12 }
  0x1e   : > { %2725 = dma.hbm_to_vmem [thread:$0]  (!%p3170_p12), %s227_s16, 512, %s229_s2, [#allocation6], %s3064_s19, %s3064_s19, %s3065_s20  }
  0x1f   : > { %s3070_s14 = smov [#allocation8]   ;;  %s3071_s23 = smov 128  }
  0x20   : > { %s242_s26 = sshll.u32 %s3070_s14, 4  ;;  %s3072_s18 = smov 8   ;;  %s243_s26 = int_to_ptr.vmem [resolvable:$true] %s242_s26 }
  0x21   : > { %2728 = dma.hbm_to_vmem [thread:$0]  (!%p3170_p12), %s241_s12, 5376, %s243_s26, [#allocation9], %s3071_s23, %s3071_s23, %s3072_s18  }
  0x22   : > { %268 = sbr.rel (%p3159_p10) target bundleno = 2301 (0x8fd), region = 44 }
  0x27   : > { %3032 = dma.done.wait (%p2733_p9), [#allocation3], 1536  }
  0x28   : > { %3034 = vsyncadd (%p2733_p9), [#allocation3], 4294965760 }
  0x29   : > { %3036 = dma.done.wait (%p2733_p9), [#allocation6], 1024  }
  0x2a   : > { %3038 = vsyncadd (%p2733_p9), [#allocation6], 4294966272 }
  0x2b   : > { %3040 = dma.done.wait (%p2733_p9), [#allocation9], 5376  }
  0x2c   : > { %3042 = vsyncadd (%p2733_p9), [#allocation9], 4294961920  ;;  %v2621_v0 = vld [vmem:[%s3783_s1 + $0x38] sm:$0xff]  ;;  %v2620_v2 = vld [vmem:[%s3783_s1 + $0x30] sm:$0xff]  ;;  %s2156_s13 = sshll.u32 %s3131_s25, 2  ;;  %vm1128_vm0 = vcmask 523264  }
  0x2d   : > { %v2637_v1 = vld [vmem:[%s3783_s1 + $0xb8] sm:$0xff]  ;;  %976 = vmatpush.bf16.msra.mxu0 %v2621_v0  ;;  %v2636_v3 = vld [vmem:[%s3783_s1 + $0xb0] sm:$0xff]  ;;  %v2619_v4 = vld [vmem:[%s3783_s1 + $0x28] sm:$0xff]  ;;  %p316_p13 = scmp.lt.s32.totalorder %s2156_s13, 7  ;;  %vm1408_vm14 = vcmask 261120   ;;  %s312_s15 = sand.u32 1, %s3053_s22  }
  0x2e   : > { %1014 = vmatpush.bf16.msra.mxu3 %v2637_v1  ;;  %v2635_v5 = vld [vmem:[%s3783_s1 + $0xa8] sm:$0xff]  ;;  %v2618_v6 = vld [vmem:[%s3783_s1 + $0x20] sm:$0xff]  ;;  %v2617_v8 = vld [vmem:[%s3783_s1 + $0x18] sm:$0xff]  ;;  %s2155_s20 = sshll.u32 %s312_s15, 3  ;;  %s2028_s12 = scalar_lea.sflag [#allocation4], %s312_s15 }
  0x2f   : > { %v2634_v7 = vld [vmem:[%s3783_s1 + $0xa0] sm:$0xff]  ;;  %v2633_v9 = vld [vmem:[%s3783_s1 + $0x98] sm:$0xff]  ;;  %s3806_s13 = smov (!%p316_p13, %s2156_s13), 7  ;;  %v2616_v10 = vld [vmem:[%s3783_s1 + $0x10] sm:$0xff]  ;;  %s314_s11 = scalar_lea.vmem [#allocation10], %s2155_s20 }
  0x30   : > { %v2632_v11 = vld [vmem:[%s3783_s1 + $0x90] sm:$0xff]  ;;  %s2597_s19 = sshll.u32 %s3806_s13, 5  ;;  %v2669_v12 = vld [vmem:[%s3783_s1 + $0x1b8] sm:$0xff]  ;;  %v2615_v13 = vld [vmem:[%s3783_s1 + $0x8] sm:$0xff]  ;;  %s2040_s16 = sshll.u32 %s314_s11, 4  ;;  %s2041_s16 = int_to_ptr.vmem [resolvable:$true] %s2040_s16 }
  0x31   : > { %977 = vmatpush.bf16.msra.mxu0 %v2620_v2  ;;  %1090 = vmatpush.bf16.msra.mxu2 %v2669_v12  ;;  %v2631_v14 = vld [vmem:[%s3783_s1 + $0x88] sm:$0xff]  ;;  %s3254_s14 = scalar_lea.vmem %s3782_s0, %s2597_s19  ;;  %v2661_v15 = vld [vmem:[%s3783_s1 + $0x178] sm:$0xff]  ;;  %v2668_v16 = vld [vmem:[%s3783_s1 + $0x1b0] sm:$0xff]  ;;  %s2594_s19 = sshll.u32 %s3131_s25, 3 }
  0x32   : > { %1015 = vmatpush.bf16.msra.mxu3 %v2636_v3  ;;  %v2614_v17 = vld [vmem:[%s3783_s1] sm:$0xff]  ;;  %1071 = vmatpush.bf16.msra.mxu1 %v2661_v15  ;;  %v2169_v21 = vld [vmem:[%s3254_s14 + $0x8] sm:$0xf]  ;;  %v2629_v23 = vld [vmem:[%s3783_s1 + $0x78] sm:$0xff]  ;;  %s2038_s10 = scalar_lea.hbm %s3788_s6, %s2594_s19  ;;  %s3007_s2 = scalar_lea.hbm %s3788_s6, 16 }
  0x33   : > { %v2630_v18 = vld [vmem:[%s3783_s1 + $0x80] sm:$0xff]  ;;  %v2603_v22 = vld [vmem:[%s3254_s14 + $0x24] sm:$0xf0]  ;;  %v2645_v24 = vld [vmem:[%s3783_s1 + $0xf8] sm:$0xff]  ;;  %s2042_s17 = sshll.u32 %s2038_s10, 4  ;;  %s2043_s17 = int_to_ptr.hbm [resolvable:$true] %s2042_s17 }
  0x34   : > { %v2161_v19 = vld [vmem:[%s3254_s14] sm:$0xf]  ;;  %v2660_v25 = vld [vmem:[%s3783_s1 + $0x170] sm:$0xff]  ;;  %v2667_v26 = vld [vmem:[%s3783_s1 + $0x1a8] sm:$0xff]  ;;  %v2170_v28 = vor.u32 %v2603_v22, %v2169_v21  ;;  %s3001_s13 = sshra.s32 %s2043_s17, 4  ;;  %s3002_s13 = int_to_ptr.hbm [resolvable:$true] %s3001_s13 }
  0x35   : > { %978 = vmatpush.bf16.msra.mxu0 %v2619_v4  ;;  %v2602_v20 = vld [vmem:[%s3254_s14 + $0x1c] sm:$0xf0]  ;;  %1091 = vmatpush.bf16.msra.mxu2 %v2668_v16  ;;  %v2628_v29 = vld [vmem:[%s3783_s1 + $0x70] sm:$0xff]  ;;  %v2659_v31 = vld [vmem:[%s3783_s1 + $0x168] sm:$0xff]  ;;  %s3003_s26 = scalar_lea.hbm %s3002_s13, 8  ;;  %p3008_p3 = scmp.lt.s32.totalorder %s3002_s13, %s3788_s6 }
  0x36   : > { %1016 = vmatpush.bf16.msra.mxu3 %v2635_v5  ;;  %v2162_v27 = vor.u32 %v2602_v20, %v2161_v19  ;;  %1072 = vmatpush.bf16.msra.mxu1 %v2660_v25  ;;  %v2644_v30 = vld [vmem:[%s3783_s1 + $0xf0] sm:$0xff]  ;;  %v2666_v32 = vld [vmem:[%s3783_s1 + $0x1a0] sm:$0xff]  ;;  %v2627_v33 = vld [vmem:[%s3783_s1 + $0x68] sm:$0xff]  ;;  %p3004_p0 = scmp.ne.s32.totalorder %s3002_s13, %s3003_s26  ;;  %p3009_p4 = scmp.lt.s32.totalorder %s3007_s2, %s3003_s26 }
  0x37   : > { %v2643_v34 = vld [vmem:[%s3783_s1 + $0xe8] sm:$0xff]  ;;  %v2658_v35 = vld [vmem:[%s3783_s1 + $0x160] sm:$0xff]  ;;  %v2665_v36 = vld [vmem:[%s3783_s1 + $0x198] sm:$0xff] }
  0x38   : > { %v2626_v37 = vld [vmem:[%s3783_s1 + $0x60] sm:$0xff]  ;;  %v2657_v39 = vld [vmem:[%s3783_s1 + $0x158] sm:$0xff]  ;;  %v2664_v40 = vld [vmem:[%s3783_s1 + $0x190] sm:$0xff]  ;;  %p3005_p1 = pnand %p3004_p0, %p3148_p5  ;;  %p3010_p7 = por %p3009_p4, %p3008_p3 }
  0x39   : > { %979 = vmatpush.bf16.msra.mxu0 %v2618_v6  ;;  %1092 = vmatpush.bf16.msra.mxu2 %v2667_v26  ;;  %v2642_v38 = vld [vmem:[%s3783_s1 + $0xe0] sm:$0xff]  ;;  %v2201_v43 = vld [vmem:[%s3254_s14 + $0x48] sm:$0xf]  ;;  %v2625_v45 = vld [vmem:[%s3783_s1 + $0x58] sm:$0xff] }
  0x3a   : > { %1017 = vmatpush.bf16.msra.mxu3 %v2634_v7  ;;  %1073 = vmatpush.bf16.msra.mxu1 %v2659_v31  ;;  %v2193_v41 = vld [vmem:[%s3254_s14 + $0x40] sm:$0xf]  ;;  %v2611_v44 = vld [vmem:[%s3254_s14 + $0x64] sm:$0xf0]  ;;  %v2641_v46 = vld [vmem:[%s3783_s1 + $0xd8] sm:$0xff]  ;;  %p3006_p2 = pneg %p3005_p1 }
  0x3b   : > { %v2610_v42 = vld [vmem:[%s3254_s14 + $0x5c] sm:$0xf0]  ;;  %v2656_v47 = vld [vmem:[%s3783_s1 + $0x150] sm:$0xff]  ;;  %v2663_v48 = vld [vmem:[%s3783_s1 + $0x188] sm:$0xff]  ;;  %v2202_v50 = vor.u32 %v2611_v44, %v2201_v43 }
  0x3c   : > { %v2194_v49 = vor.u32 %v2610_v42, %v2193_v41  ;;  %v2624_v51 = vld [vmem:[%s3783_s1 + $0x50] sm:$0xff]  ;;  %v2655_v53 = vld [vmem:[%s3783_s1 + $0x148] sm:$0xff]  ;;  %v2662_v54 = vld [vmem:[%s3783_s1 + $0x180] sm:$0xff]  ;;  %p3011_p8 = pnand %p3010_p7, %p3006_p2 }
  0x3d   : > { %980 = vmatpush.bf16.msra.mxu0 %v2617_v8  ;;  %1093 = vmatpush.bf16.msra.mxu2 %v2666_v32  ;;  %v2640_v52 = vld [vmem:[%s3783_s1 + $0xd0] sm:$0xff]  ;;  %v2185_v55 = vld [vmem:[%s3254_s14 + $0x18] sm:$0xf]  ;;  %v2623_v57 = vld [vmem:[%s3783_s1 + $0x48] sm:$0xff] }
  0x3e   : > { %1018 = vmatpush.bf16.msra.mxu3 %v2633_v9  ;;  %1074 = vmatpush.bf16.msra.mxu1 %v2658_v35  ;;  %v2605_v56 = vld [vmem:[%s3254_s14 + $0x34] sm:$0xf0]  ;;  %v2639_v58 = vld [vmem:[%s3783_s1 + $0xc8] sm:$0xff]  ;;  %v2654_v60 = vld [vmem:[%s3783_s1 + $0x140] sm:$0xff] }
  0x3f   : > { %v2186_v59 = vor.u32 %v2605_v56, %v2185_v55  ;;  %v2600_v61 = vld [vmem:[%s3254_s14 + $0x14] sm:$0xf]  ;;  %v2622_v63 = vld [vmem:[%s3783_s1 + $0x40] sm:$0xff]  ;;  %v2653_v1 = vld [vmem:[%s3783_s1 + $0x138] sm:$0xff] }
  0x40   : > { %v2179_v62 = vld [vmem:[%s3254_s14 + $0x30] sm:$0xf0]  ;;  %v2638_v0 = vld [vmem:[%s3783_s1 + $0xc0] sm:$0xff]  ;;  %v2677_v2 = vld [vmem:[%s3783_s1 + $0x1f8] sm:$0xff] }
  0x41   : > { %981 = vmatpush.bf16.msra.mxu0 %v2616_v10  ;;  %1094 = vmatpush.bf16.msra.mxu2 %v2665_v36  ;;  %v2598_v3 = vld [vmem:[%s3254_s14 + $0x4] sm:$0xf]  ;;  %v2182_v4 = vor.u32 %v2600_v61, %v2179_v62  ;;  %v2599_v6 = vld [vmem:[%s3254_s14 + $0xc] sm:$0xf]  ;;  %v2652_v8 = vld [vmem:[%s3783_s1 + $0x130] sm:$0xff] }
  0x42   : > { %1019 = vmatpush.bf16.msra.mxu3 %v2632_v11  ;;  %1075 = vmatpush.bf16.msra.mxu1 %v2657_v39  ;;  %v2163_v5 = vld [vmem:[%s3254_s14 + $0x20] sm:$0xf0]  ;;  %v2171_v7 = vld [vmem:[%s3254_s14 + $0x28] sm:$0xf0]  ;;  %v2676_v9 = vld [vmem:[%s3783_s1 + $0x1f0] sm:$0xff] }
  0x43   : > { %v2166_v10 = vor.u32 %v2598_v3, %v2163_v5  ;;  %v2174_v11 = vor.u32 %v2599_v6, %v2171_v7  ;;  %v2651_v12 = vld [vmem:[%s3783_s1 + $0x128] sm:$0xff]  ;;  %v2613_v15 = vld [vmem:[%s3254_s14 + $0x74] sm:$0xf0]  ;;  %v2650_v16 = vld [vmem:[%s3783_s1 + $0x120] sm:$0xff] }
  0x44   : > { %v2608_v19 = vld [vmem:[%s3254_s14 + $0x54] sm:$0xf]  ;;  %v2649_v21 = vld [vmem:[%s3783_s1 + $0x118] sm:$0xff]  ;;  %v2195_v25 = vld [vmem:[%s3254_s14 + $0x60] sm:$0xf0] }
  0x45   : > { %982 = vmatpush.bf16.msra.mxu0 %v2615_v13  ;;  %1095 = vmatpush.bf16.msra.mxu2 %v2664_v40  ;;  %v2675_v13 = vld [vmem:[%s3783_s1 + $0x1e8] sm:$0xff]  ;;  %v2211_v20 = vld [vmem:[%s3254_s14 + $0x70] sm:$0xf0]  ;;  %v2673_v22 = vld [vmem:[%s3783_s1 + $0x1d8] sm:$0xff] }
  0x46   : > { %1020 = vmatpush.bf16.msra.mxu3 %v2631_v14  ;;  %1076 = vmatpush.bf16.msra.mxu1 %v2656_v47  ;;  %v2217_v14 = vld [vmem:[%s3254_s14 + $0x58] sm:$0xf]  ;;  %v2607_v26 = vld [vmem:[%s3254_s14 + $0x4c] sm:$0xf]  ;;  %v2670_v35 = vld [vmem:[%s3783_s1 + $0x1c0] sm:$0xff] }
  0x47   : > { %v2647_v32 = vld [vmem:[%s3783_s1 + $0x108] sm:$0xff]  ;;  %v2177_v36 = vld [vmem:[%s3254_s14 + $0x10] sm:$0xf]  ;;  %v2187_v39 = vld [vmem:[%s3254_s14 + $0x38] sm:$0xf0] }
  0x48   : > { %v2209_v42 = vld [vmem:[%s3254_s14 + $0x50] sm:$0xf]  ;;  %v2609_v44 = vld [vmem:[%s3254_s14 + $0x5c] sm:$0xf]  ;;  %v327_v61 = vld [vmem:[#allocation8 + $0x8] sm:$0xff] }
  0x49   : > { %983 = vmatpush.bf16.msra.mxu0 %v2614_v17  ;;  %1096 = vmatpush.bf16.msra.mxu2 %v2663_v48  ;;  %v2674_v17 = vld [vmem:[%s3783_s1 + $0x1e0] sm:$0xff]  ;;  %v2612_v43 = vld [vmem:[%s3254_s14 + $0x6c] sm:$0xf0] }
  0x4a   : > { %1021 = vmatpush.bf16.msra.mxu3 %v2630_v18  ;;  %1077 = vmatpush.bf16.msra.mxu1 %v2655_v53  ;;  %v2218_v18 = vor.u32 %v2613_v15, %v2217_v14 }
  0x4c   : > { %984 = vmatmul.bf16.vlgmr.msra.gmra.mxu0 %v2162_v27  ;;  %v2203_v27 = vld [vmem:[%s3254_s14 + $0x68] sm:$0xf0] }
  0x4d   : > { %995 = vmatpush.bf16.msrb.mxu0 %v2629_v23  ;;  %1022 = vmatmul.bf16.vlgmr.msra.gmra.mxu3 %v2170_v28  ;;  %v2606_v23 = vld [vmem:[%s3254_s14 + $0x44] sm:$0xf]  ;;  %v2648_v28 = vld [vmem:[%s3783_s1 + $0x110] sm:$0xff]  ;;  %v2206_v31 = vor.u32 %v2607_v26, %v2203_v27 }
  0x4e   : > { %1033 = vmatpush.bf16.msrb.mxu3 %v2645_v24  ;;  %1097 = vmatpush.bf16.msra.mxu2 %v2662_v54  ;;  %v2214_v24 = vor.u32 %v2608_v19, %v2211_v20  ;;  %v330_v27 = vld [vmem:[#allocation8 + $0x20] sm:$0xff] }
  0x4f   : > { %1078 = vmatpush.bf16.msra.mxu1 %v2654_v60 }
  0x51   : > { %996 = vmatpush.bf16.msrb.mxu0 %v2628_v29  ;;  %1098 = vmatmul.bf16.vlgmr.msra.gmra.mxu2 %v2186_v59  ;;  %v2672_v29 = vld [vmem:[%s3783_s1 + $0x1d0] sm:$0xff] }
  0x52   : > { %1034 = vmatpush.bf16.msrb.mxu3 %v2644_v30  ;;  %1079 = vmatmul.bf16.vlgmr.msra.gmra.mxu1 %v2182_v4  ;;  %v2198_v30 = vor.u32 %v2606_v23, %v2195_v25 }
  0x55   : > { %997 = vmatpush.bf16.msrb.mxu0 %v2627_v33  ;;  %v2671_v33 = vld [vmem:[%s3783_s1 + $0x1c8] sm:$0xff] }
  0x56   : > { %1035 = vmatpush.bf16.msrb.mxu3 %v2643_v34  ;;  %v2646_v34 = vld [vmem:[%s3783_s1 + $0x100] sm:$0xff] }
  0x59   : > { %998 = vmatpush.bf16.msrb.mxu0 %v2626_v37  ;;  %v2604_v37 = vld [vmem:[%s3254_s14 + $0x2c] sm:$0xf0] }
  0x5a   : > { %1036 = vmatpush.bf16.msrb.mxu3 %v2642_v38  ;;  %v2601_v38 = vld [vmem:[%s3254_s14 + $0x1c] sm:$0xf]  ;;  %v2178_v40 = vor.u32 %v2604_v37, %v2177_v36 }
  0x5b   : > { %v2190_v41 = vor.u32 %v2601_v38, %v2187_v39 }
  0x5c   : > { %989 = vmatmul.bf16.gmra.mxu0 %v2194_v49 }
  0x5d   : > { %999 = vmatpush.bf16.msrb.mxu0 %v2625_v45  ;;  %1027 = vmatmul.bf16.gmra.mxu3 %v2202_v50  ;;  %v2219_v45 = vld [vmem:[%s3254_s14 + $0x78] sm:$0xf0]  ;;  %s3074_s14 = smov 64  }
  0x5e   : > { %1037 = vmatpush.bf16.msrb.mxu3 %v2641_v46  ;;  %v2210_v46 = vor.u32 %v2612_v43, %v2209_v42  ;;  %v2222_v47 = vor.u32 %v2609_v44, %v2219_v45 }
  0x61   : > { %1000 = vmatpush.bf16.msrb.mxu0 %v2624_v51  ;;  %1103 = vmatmul.bf16.gmra.mxu2 %v2218_v18 }
  0x62   : > { %1038 = vmatpush.bf16.msrb.mxu3 %v2640_v52  ;;  %1084 = vmatmul.bf16.gmra.mxu1 %v2214_v24 }
  0x65   : > { %1001 = vmatpush.bf16.msrb.mxu0 %v2623_v57 }
  0x66   : > { %1039 = vmatpush.bf16.msrb.mxu3 %v2639_v58 }
  0x69   : > { %1002 = vmatpush.bf16.msrb.mxu0 %v2622_v63 }
  0x6a   : > { %1040 = vmatpush.bf16.msrb.mxu3 %v2638_v0 }
  0x6c   : > { %1003 = vmatmul.bf16.vlgmr.msrb.gmra.mxu0 %v2166_v10 }
  0x6d   : > { %1052 = vmatpush.bf16.msra.mxu0 %v2653_v1  ;;  %1041 = vmatmul.bf16.vlgmr.msrb.gmra.mxu3 %v2174_v11 }
  0x6e   : > { %1109 = vmatpush.bf16.msra.mxu3 %v2677_v2  ;;  %v328_v2 = vld [vmem:[#allocation8 + $0x10] sm:$0xff] }
  0x71   : > { %1053 = vmatpush.bf16.msra.mxu0 %v2652_v8 }
  0x72   : > { %1110 = vmatpush.bf16.msra.mxu3 %v2676_v9 }
  0x75   : > { %1054 = vmatpush.bf16.msra.mxu0 %v2651_v12 }
  0x76   : > { %1111 = vmatpush.bf16.msra.mxu3 %v2675_v13  ;;  %v329_v13 = vld [vmem:[#allocation8 + $0x18] sm:$0xff] }
  0x79   : > { %1055 = vmatpush.bf16.msra.mxu0 %v2650_v16 }
  0x7a   : > { %1112 = vmatpush.bf16.msra.mxu3 %v2674_v17 }
  0x7c   : > { %1008 = vmatmul.bf16.gmra.mxu0 %v2198_v30 }
  0x7d   : > { %1056 = vmatpush.bf16.msra.mxu0 %v2649_v21  ;;  %1046 = vmatmul.bf16.gmra.mxu3 %v2206_v31 }
  0x7e   : > { %1113 = vmatpush.bf16.msra.mxu3 %v2673_v22 }
  0x81   : > { %1057 = vmatpush.bf16.msra.mxu0 %v2648_v28 }
  0x82   : > { %1114 = vmatpush.bf16.msra.mxu3 %v2672_v29 }
  0x85   : > { %1058 = vmatpush.bf16.msra.mxu0 %v2647_v32 }
  0x86   : > { %1115 = vmatpush.bf16.msra.mxu3 %v2671_v33 }
  0x89   : > { %1059 = vmatpush.bf16.msra.mxu0 %v2646_v34 }
  0x8a   : > { %1116 = vmatpush.bf16.msra.mxu3 %v2670_v35 }
  0x8c   : > { %1060 = vmatmul.bf16.vlgmr.msra.gmra.mxu0 %v2178_v40 }
  0x8d   : > { %1117 = vmatmul.bf16.vlgmr.msra.gmra.mxu3 %v2190_v41 }
  0x9c   : > { %1065 = vmatmul.bf16.gmra.mxu0 %v2210_v46 }
  0x9d   : > { %1122 = vmatmul.bf16.gmra.mxu3 %v2222_v47 }
  0xc9   : > { %v985_v48 = vpop.f32.mrf.mxu0 }
  0xca   : > { %v986_v63 = vadd.f32 %v985_v48, %v327_v61 }
  0xcf   : > { %v1080_v3 = vpop.f32.mrf.mxu1 }
  0xd0   : > { %v1023_v49 = vpop.f32.mrf.mxu3 }
  0xd1   : > { %v987_v50 = vpop.f32.mrf.mxu0 }
  0xd2   : > { %v988_v7 = vadd.f32 %v987_v50, %v328_v2 }
  0xd4   : > { %v1099_v5 = vpop.f32.mrf.mxu2 }
  0xd7   : > { %v1082_v16 = vpop.f32.mrf.mxu1 }
  0xd8   : > { %v1025_v51 = vpop.f32.mrf.mxu3 }
  0xd9   : > { %v990_v52 = vpop.f32.mrf.mxu0 }
  0xda   : > { %v991_v18 = vadd.f32 %v990_v52, %v329_v13 }
  0xdc   : > { %v1101_v21 = vpop.f32.mrf.mxu2 }
  0xdf   : > { %v1085_v34 = vpop.f32.mrf.mxu1 }
  0xe0   : > { %v1028_v53 = vpop.f32.mrf.mxu3 }
  0xe1   : > { %v992_v54 = vpop.f32.mrf.mxu0 }
  0xe2   : > { %v993_v31 = vadd.f32 %v992_v54, %v330_v27  ;;  %v2689_v27 = vld [vmem:[#allocation2 + $0x58] sm:$0xf0] }
  0xe4   : > { %v1104_v39 = vpop.f32.mrf.mxu2 }
  0xe8   : > { %v1030_v55 = vpop.f32.mrf.mxu3 }
  0xe9   : > { %v1004_v56 = vpop.f32.mrf.mxu0 }
  0xea   : > { %v1005_v1 = vadd.f32 %v1004_v56, %v986_v63  ;;  %v3073_v56 = vmov 64.0  }
  0xeb   : > { %2791 = vrcp.f32 %v3073_v56 }
  0xec   : > { %v1024_v4 = vadd.f32 %v1023_v49, %v1005_v1  ;;  %v1087_v49 = vpop.f32.mrf.mxu1 }
  0xf0   : > { %v1042_v57 = vpop.f32.mrf.mxu3 }
  0xf1   : > { %v1006_v58 = vpop.f32.mrf.mxu0  ;;  %v1043_v8 = vadd.f32 %v1042_v57, %v1024_v4  ;;  %v2792_v57 = vpop.eup %2791 }
  0xf2   : > { %v1007_v10 = vadd.f32 %v1006_v58, %v988_v7  ;;  %v1142_v58 = vmul.f32 64.0, %v2792_v57  ;;  %vm1146_vm1 = vweird.f32 %v2792_v57 }
  0xf4   : > { %v1026_v14 = vadd.f32 %v1025_v51, %v1007_v10  ;;  %v1106_v51 = vpop.f32.mrf.mxu2 }
  0xf8   : > { %v1044_v59 = vpop.f32.mrf.mxu3 }
  0xf9   : > { %v1009_v60 = vpop.f32.mrf.mxu0  ;;  %v1045_v19 = vadd.f32 %v1044_v59, %v1026_v14  ;;  %v1143_v59 = vsub.f32 1.0, %v1142_v58  ;;  %v2679_v58 = vld [vmem:[#allocation2 + $0x8] sm:$0xf0] }
  0xfa   : > { %v1010_v23 = vadd.f32 %v1009_v60, %v991_v18 }
  0xfb   : > { %v1144_v60 = vmul.f32 %v2792_v57, %v1143_v59 }
  0xfc   : > { %v1029_v28 = vadd.f32 %v1028_v53, %v1010_v23  ;;  %v2687_v23 = vld [vmem:[#allocation2 + $0x4c] sm:$0xf] }
  0xfd   : > { %v1145_v61 = vadd.f32 %v2792_v57, %v1144_v60  ;;  %v2678_v60 = vld [vmem:[#allocation2 + $0x4] sm:$0xf] }
 0x100   : > { %v1047_v62 = vpop.f32.mrf.mxu3 }
 0x101   : > { %v1011_v0 = vpop.f32.mrf.mxu0  ;;  %v1048_v32 = vadd.f32 %v1047_v62, %v1029_v28  ;;  %v3451_v62 = vsel %vm1146_vm1, %v2792_v57, %v1145_v61  ;;  %v2481_v57 = vld [vmem:[#allocation2] sm:$0xf]  ;;  %v2483_v61 = vld [vmem:[#allocation2 + $0xc] sm:$0xf0] }
 0x102   : > { %v1012_v36 = vadd.f32 %v1011_v0, %v993_v31  ;;  %v332_v31 = vld [vmem:[#allocation8 + $0x30] sm:$0xff]  ;;  %v2482_v59 = vor.u32 %v2679_v58, %v2481_v57 }
 0x104   : > { %v1031_v41 = vadd.f32 %v1030_v55, %v1012_v36  ;;  %v2684_v36 = vld [vmem:[#allocation2 + $0x34] sm:$0xf] }
 0x108   : > { %v1049_v6 = vpop.f32.mrf.mxu3 }
 0x109   : > { %v1061_v9 = vpop.f32.mrf.mxu0  ;;  %v1050_v44 = vadd.f32 %v1049_v6, %v1031_v41  ;;  %v2686_v41 = vld [vmem:[#allocation2 + $0x40] sm:$0xf0] }
 0x10a   : > { %v1062_v11 = vadd.f32 %v1061_v9, %v1043_v8 }
 0x10c   : > { %v1081_v12 = vadd.f32 %v1080_v3, %v1062_v11 }
 0x10e   : > { %v1100_v15 = vadd.f32 %v1099_v5, %v1081_v12 }
 0x110   : > { %v1118_v17 = vpop.f32.mrf.mxu3 }
 0x111   : > { %v3435_v20 = vadd.f32 %v1118_v17, %v1100_v15  ;;  %v1063_v22 = vpop.f32.mrf.mxu0 }
 0x112   : > { %v1064_v24 = vadd.f32 %v1063_v22, %v1045_v19  ;;  %v3481_v19 = vld [vmem:[#allocation8] ss:$0 sm:$0xff]  ;;  %v2688_v22 = vld [vmem:[#allocation2 + $0x50] sm:$0xf0] }
 0x113   : > { %v1129_v25 = vsel %vm1128_vm0, %v3435_v20, 0.0 }
 0x114   : > { %1130 = vadd.xlane.f32.xlu0 %v1129_v25  ;;  %v1083_v26 = vadd.f32 %v1082_v16, %v1064_v24  ;;  %v2519_v25 = vld [vmem:[#allocation2 + $0x54] sm:$0xf0] }
 0x115   : > { %v2522_v28 = vor.u32 %v2687_v23, %v2519_v25 }
 0x116   : > { %v1102_v29 = vadd.f32 %v1101_v21, %v1083_v26  ;;  %v2517_v21 = vld [vmem:[#allocation2 + $0x48] sm:$0xf]  ;;  %v2525_v26 = vld [vmem:[#allocation2 + $0x50] sm:$0xf] }
 0x117   : > { %v2518_v24 = vor.u32 %v2688_v22, %v2517_v21  ;;  %1352 = vmatpush.bf16.msrb.mxu1 %v2522_v28 }
 0x118   : > { %v1120_v30 = vpop.f32.mrf.mxu3 }
 0x119   : > { %v3439_v33 = vadd.f32 %v1120_v30, %v1102_v29  ;;  %v1066_v35 = vpop.f32.mrf.mxu0  ;;  %v2526_v29 = vor.u32 %v2689_v27, %v2525_v26  ;;  %v331_v30 = vld [vmem:[#allocation8 + $0x28] sm:$0xff]  ;;  %1333 = vmatpush.bf16.msrb.mxu0 %v2518_v24 }
 0x11a   : > { %v1067_v37 = vadd.f32 %v1066_v35, %v1048_v32  ;;  %v1386_v32 = vpack.c.bf16 %v332_v31, %v331_v30  ;;  %v2685_v35 = vld [vmem:[#allocation2 + $0x38] sm:$0xf0] }
 0x11b   : > { %v1132_v38 = vsel %vm1128_vm0, %v3439_v33, 0.0  ;;  %1371 = vmatpush.bf16.msrb.mxu2 %v2526_v29 }
 0x11c   : > { %1133 = vadd.xlane.f32.xlu0 %v1132_v38  ;;  %v1086_v40 = vadd.f32 %v1085_v34, %v1067_v37  ;;  %v2505_v34 = vld [vmem:[#allocation2 + $0x30] sm:$0xf]  ;;  %v2507_v38 = vld [vmem:[#allocation2 + $0x3c] sm:$0xf0] }
 0x11d   : > { %v2506_v37 = vor.u32 %v2685_v35, %v2505_v34 }
 0x11e   : > { %v1105_v42 = vadd.f32 %v1104_v39, %v1086_v40  ;;  %v2513_v39 = vld [vmem:[#allocation2 + $0x38] sm:$0xf]  ;;  %v2510_v40 = vor.u32 %v2684_v36, %v2507_v38 }
 0x11f   : > { %1334 = vmatpush.bf16.msrb.mxu0 %v2506_v37 }
 0x120   : > { %v1123_v43 = vpop.f32.mrf.mxu3  ;;  %1353 = vmatpush.bf16.msrb.mxu1 %v2510_v40 }
 0x121   : > { %v3443_v45 = vadd.f32 %v1123_v43, %v1105_v42  ;;  %v1068_v46 = vpop.f32.mrf.mxu0  ;;  %v2514_v42 = vor.u32 %v2686_v41, %v2513_v39  ;;  %v2493_v43 = vld [vmem:[#allocation2 + $0x18] sm:$0xf] }
 0x122   : > { %v1069_v47 = vadd.f32 %v1068_v46, %v1050_v44  ;;  %v2682_v44 = vld [vmem:[#allocation2 + $0x20] sm:$0xf0]  ;;  %v2681_v46 = vld [vmem:[#allocation2 + $0x1c] sm:$0xf] }
 0x123   : > { %v1135_v48 = vsel %vm1128_vm0, %v3443_v45, 0.0  ;;  %1372 = vmatpush.bf16.msrb.mxu2 %v2514_v42 }
 0x124   : > { %1136 = vadd.xlane.f32.xlu1 %v1135_v48  ;;  %v1088_v50 = vadd.f32 %v1087_v49, %v1069_v47  ;;  %v2494_v48 = vor.u32 %v2682_v44, %v2493_v43  ;;  %v2495_v49 = vld [vmem:[#allocation2 + $0x24] sm:$0xf0] }
 0x126   : > { %v1107_v52 = vadd.f32 %v1106_v51, %v1088_v50  ;;  %v2501_v50 = vld [vmem:[#allocation2 + $0x20] sm:$0xf]  ;;  %v2683_v51 = vld [vmem:[#allocation2 + $0x28] sm:$0xf0]  ;;  %1335 = vmatpush.bf16.msrb.mxu0 %v2494_v48 }
 0x128   : > { %v1125_v53 = vpop.f32.mrf.mxu3 }
 0x129   : > { %v3447_v54 = vadd.f32 %v1125_v53, %v1107_v52  ;;  %v2498_v53 = vor.u32 %v2681_v46, %v2495_v49 }
 0x12a   : > { %1336 = vmatpush.bf16.msrb.mxu0 %v2482_v59 }
 0x12b   : > { %v1138_v55 = vsel %vm1128_vm0, %v3447_v54, 0.0  ;;  %1354 = vmatpush.bf16.msrb.mxu1 %v2498_v53 }
 0x12c   : > { %1139 = vadd.xlane.f32.xlu1 %v1138_v55  ;;  %v2502_v55 = vor.u32 %v2683_v51, %v2501_v50 }
 0x12e   : > { %1373 = vmatpush.bf16.msrb.mxu2 %v2502_v55 }
 0x187   : > { %v1131_v63 = vpop.xlane.xlu0 %1130 }
 0x188   : > { %v1148_v0 = vmul.f32 %v3451_v62, %v1131_v63  ;;  %v2489_v63 = vld [vmem:[#allocation2 + $0x8] sm:$0xf] }
 0x18a   : > { %v3455_v1 = vsub.f32 %v3435_v20, %v1148_v0  ;;  %v2486_v0 = vor.u32 %v2678_v60, %v2483_v61 }
 0x18c   : > { %v1156_v2 = vmul.f32 %v3455_v1, %v3455_v1  ;;  %1355 = vmatpush.bf16.msrb.mxu1 %v2486_v0 }
 0x18e   : > { %v1160_v3 = vsel %vm1128_vm0, %v1156_v2, 0.0  ;;  %v2680_v2 = vld [vmem:[#allocation2 + $0x10] sm:$0xf0] }
 0x18f   : > { %1161 = vadd.xlane.f32.xlu2 %v1160_v3  ;;  %v1134_v4 = vpop.xlane.xlu0 %1133  ;;  %v2490_v3 = vor.u32 %v2680_v2, %v2489_v63 }
 0x190   : > { %v1149_v5 = vmul.f32 %v3451_v62, %v1134_v4 }
 0x191   : > { %1374 = vmatpush.bf16.msrb.mxu2 %v2490_v3 }
 0x192   : > { %v3462_v6 = vsub.f32 %v3439_v33, %v1149_v5 }
 0x194   : > { %v1157_v7 = vmul.f32 %v3462_v6, %v3462_v6 }
 0x196   : > { %v1163_v8 = vsel %vm1128_vm0, %v1157_v7, 0.0  ;;  %v333_v7 = vld [vmem:[#allocation8 + $0x38] sm:$0xff] }
 0x197   : > { %v1137_v9 = vpop.xlane.xlu1 %1136  ;;  %1164 = vadd.xlane.f32.xlu2 %v1163_v8  ;;  %v334_v8 = vld [vmem:[#allocation8 + $0x40] sm:$0xff] }
 0x198   : > { %v1150_v10 = vmul.f32 %v3451_v62, %v1137_v9  ;;  %v1387_v9 = vpack.c.bf16 %v334_v8, %v333_v7 }
 0x19a   : > { %v3469_v11 = vsub.f32 %v3443_v45, %v1150_v10 }
 0x19c   : > { %v1158_v12 = vmul.f32 %v3469_v11, %v3469_v11 }
 0x19e   : > { %v1166_v13 = vsel %vm1128_vm0, %v1158_v12, 0.0 }
 0x19f   : > { %v1140_v14 = vpop.xlane.xlu1 %1139  ;;  %1167 = vadd.xlane.f32.xlu0 %v1166_v13 }
 0x1a0   : > { %v1151_v15 = vmul.f32 %v3451_v62, %v1140_v14 }
 0x1a2   : > { %v3476_v16 = vsub.f32 %v3447_v54, %v1151_v15 }
 0x1a4   : > { %v1159_v17 = vmul.f32 %v3476_v16, %v3476_v16 }
 0x1a6   : > { %v1169_v18 = vsel %vm1128_vm0, %v1159_v17, 0.0 }
 0x1a7   : > { %1170 = vadd.xlane.f32.xlu1 %v1169_v18 }
 0x1af   : > { %1230 = vrot.lane.b32.xlu2 %v3481_v19, %s3074_s14 }
 0x1c8   : > { %1392 = vxpose.xlu0.c.b16.start [1/2] (short) (narrow) %v1386_v32, 64 }
 0x1d8   : > { %1393 = vxpose.xlu0.c.b16.end [2/2] (short) (narrow) %v1387_v9, 64  ;;  %v3503_v9 = vld [vmem:[#allocation8 + $0x68] sm:$0xff] }
 0x202   : > { %v1162_v47 = vpop.xlane.xlu2 %1161 }
 0x203   : > { %v1172_v52 = vmul.f32 %v1162_v47, %v3451_v62 }
 0x205   : > { %v1176_v56 = vadd.f32 1e-05, %v1172_v52 }
 0x207   : > { %2793 = vrsqrt.f32 %v1176_v56  ;;  %vm1186_vm3 = vweird.f32 %v1176_v56 }
 0x20a   : > { %v1165_v4 = vpop.xlane.xlu2 %1164 }
 0x20b   : > { %v1173_v5 = vmul.f32 %v1165_v4, %v3451_v62 }
 0x20d   : > { %v2794_v10 = vpop.eup %2793  ;;  %v1177_v12 = vadd.f32 1e-05, %v1173_v5 }
 0x20e   : > { %v1181_v13 = vmul.f32 %v2794_v10, %v1176_v56  ;;  %vm1187_vm2 = vweird.f32 %v2794_v10 }
 0x20f   : > { %2795 = vrsqrt.f32 %v1177_v12  ;;  %vm1188_vm4 = vmor %vm1186_vm3, %vm1187_vm2  ;;  %vm1196_vm6 = vweird.f32 %v1177_v12 }
 0x210   : > { %v1182_v14 = vmul.f32 %v2794_v10, %v1181_v13  ;;  %v3513_v13 = vld [vmem:[#allocation8 + $0xb0] sm:$0xff] }
 0x212   : > { %v1183_v15 = vmul.f32 0.5, %v1182_v14  ;;  %v1168_v17 = vpop.xlane.xlu0 %1167  ;;  %v1231_v41 = vpop.permute.xlu2 %1230 }
 0x213   : > { %v1174_v18 = vmul.f32 %v1168_v17, %v3451_v62 }
 0x214   : > { %v1184_v21 = vsub.f32 1.5, %v1183_v15 }
 0x215   : > { %v2796_v22 = vpop.eup %2795  ;;  %v1178_v23 = vadd.f32 1e-05, %v1174_v18 }
 0x216   : > { %v1185_v24 = vmul.f32 %v2794_v10, %v1184_v21  ;;  %v1191_v25 = vmul.f32 %v2796_v22, %v1177_v12  ;;  %vm1197_vm5 = vweird.f32 %v2796_v22  ;;  %v3511_v12 = vld [vmem:[#allocation8 + $0x90] sm:$0xff] }
 0x217   : > { %2797 = vrsqrt.f32 %v1178_v23  ;;  %vm1198_vm7 = vmor %vm1196_vm6, %vm1197_vm5  ;;  %vm1206_vm9 = vweird.f32 %v1178_v23 }
 0x218   : > { %v1189_v26 = vsel %vm1188_vm4, %v2794_v10, %v1185_v24  ;;  %v1192_v27 = vmul.f32 %v2796_v22, %v1191_v25  ;;  %v3505_v10 = vld [vmem:[#allocation8 + $0x88] sm:$0xff] }
 0x219   : > { %v1220_v31 = vmul.f32 %v1189_v26, %v3455_v1 }
 0x21a   : > { %v1193_v28 = vmul.f32 0.5, %v1192_v27  ;;  %v1171_v29 = vpop.xlane.xlu1 %1170 }
 0x21b   : > { %v1175_v30 = vmul.f32 %v1171_v29, %v3451_v62  ;;  %v1225_v38 = vmul.f32 %v3481_v19, %v1220_v31 }
 0x21c   : > { %v1194_v32 = vsub.f32 1.5, %v1193_v28 }
 0x21d   : > { %v2798_v34 = vpop.eup %2797  ;;  %v1179_v35 = vadd.f32 1e-05, %v1175_v30  ;;  %v1233_v1 = vadd.f32 %v1231_v41, %v1225_v38 }
 0x21e   : > { %v1195_v36 = vmul.f32 %v2796_v22, %v1194_v32  ;;  %v1201_v37 = vmul.f32 %v2798_v34, %v1178_v23  ;;  %vm1207_vm8 = vweird.f32 %v2798_v34 }
 0x21f   : > { %2799 = vrsqrt.f32 %v1179_v35  ;;  %vm1208_vm10 = vmor %vm1206_vm9, %vm1207_vm8  ;;  %v1237_v51 = vmax.f32 %v1233_v1, 0.0  ;;  %vm1216_vm12 = vweird.f32 %v1179_v35 }
 0x220   : > { %v1199_v39 = vsel %vm1198_vm7, %v2796_v22, %v1195_v36  ;;  %v1202_v40 = vmul.f32 %v2798_v34, %v1201_v37 }
 0x221   : > { %v1221_v42 = vmul.f32 %v1199_v39, %v3462_v6 }
 0x222   : > { %v1203_v43 = vmul.f32 0.5, %v1202_v40 }
 0x223   : > { %v1226_v44 = vmul.f32 %v3481_v19, %v1221_v42 }
 0x224   : > { %v1204_v46 = vsub.f32 1.5, %v1203_v43 }
 0x225   : > { %v2800_v47 = vpop.eup %2799  ;;  %v1234_v48 = vadd.f32 %v1231_v41, %v1226_v44 }
 0x226   : > { %v1205_v49 = vmul.f32 %v2798_v34, %v1204_v46  ;;  %v1211_v50 = vmul.f32 %v2800_v47, %v1179_v35  ;;  %vm1217_vm11 = vweird.f32 %v2800_v47 }
 0x227   : > { %v1238_v52 = vmax.f32 %v1234_v48, 0.0  ;;  %vm1218_vm13 = vmor %vm1216_vm12, %vm1217_vm11 }
 0x228   : > { %v1209_v53 = vsel %vm1208_vm10, %v2798_v34, %v1205_v49  ;;  %v1212_v55 = vmul.f32 %v2800_v47, %v1211_v50 }
 0x229   : > { %v1241_v56 = vpack.c.bf16 %v1238_v52, %v1237_v51  ;;  %v1222_v6 = vmul.f32 %v1209_v53, %v3469_v11 }
 0x22a   : > { %v1213_v57 = vmul.f32 0.5, %v1212_v55  ;;  %v3535_v55 = vld [vmem:[#allocation8 + $0x50] sm:$0xff] }
 0x22b   : > { %2527 = vmatmul.msk.bf16.vlgmr.msrb.gmra.mxu0 %vm1128_vm0, %v1241_v56  ;;  %2529 = vmatmul.msk.bf16.vlgmr.msrb.gmra.mxu1 %vm1128_vm0, %v1241_v56  ;;  %v1227_v60 = vmul.f32 %v3481_v19, %v1222_v6 }
 0x22c   : > { %v1214_v58 = vsub.f32 1.5, %v1213_v57  ;;  %2531 = vmatmul.msk.bf16.vlgmr.msrb.gmra.mxu2 %vm1128_vm0, %v1241_v56  ;;  %v3538_v57 = vld [vmem:[#allocation8 + $0x48] sm:$0xff] }
 0x22d   : > { %v1235_v2 = vadd.f32 %v1231_v41, %v1227_v60  ;;  %v3543_v60 = vld [vmem:[#allocation8 + $0x60] sm:$0xff] }
 0x22e   : > { %v1215_v59 = vmul.f32 %v2800_v47, %v1214_v58 }
 0x22f   : > { %v1239_v3 = vmax.f32 %v1235_v2, 0.0 }
 0x230   : > { %v1219_v61 = vsel %vm1218_vm13, %v2800_v47, %v1215_v59 }
 0x231   : > { %v1223_v63 = vmul.f32 %v1219_v61, %v3476_v16  ;;  %v3507_v16 = vld [vmem:[#allocation8 + $0xa8] sm:$0xff]  ;;  %v3545_v61 = vld [vmem:[#allocation8 + $0x58] sm:$0xff] }
 0x233   : > { %v1228_v0 = vmul.f32 %v3481_v19, %v1223_v63  ;;  %v3509_v19 = vld [vmem:[#allocation8 + $0x70] sm:$0xff] }
 0x235   : > { %v1236_v11 = vadd.f32 %v1231_v41, %v1228_v0 }
 0x237   : > { %v1240_v4 = vmax.f32 %v1236_v11, 0.0  ;;  %v3551_v11 = vld [vmem:[#allocation8 + $0x80] sm:$0xff] }
 0x239   : > { %v1242_v5 = vpack.c.bf16 %v1240_v4, %v1239_v3  ;;  %v3553_v3 = vld [vmem:[#allocation8 + $0x78] sm:$0xff] }
 0x23b   : > { %2528 = vmatmul.msk.bf16.gmra.mxu0 %vm1128_vm0, %v1242_v5  ;;  %2530 = vmatmul.msk.bf16.gmra.mxu1 %vm1128_vm0, %v1242_v5 }
 0x23c   : > { %2532 = vmatmul.msk.bf16.gmra.mxu2 %vm1128_vm0, %v1242_v5 }
 0x274   : > { %v1400_v38 = vpop.trf.xlu0 }
 0x284   : > { %v1401_v40 = vpop.trf.xlu0 }
 0x2a8   : > { %v1338_v7 = vpop.f32.mrf.mxu0  ;;  %v1357_v8 = vpop.f32.mrf.mxu1 }
 0x2a9   : > { %v1475_v15 = vmul.f32 %v1338_v7, %v3503_v9  ;;  %v3517_v17 = vmul.f32 %v1338_v7, %v3505_v10  ;;  %v3520_v22 = vmul.f32 %v1338_v7, %v3507_v16  ;;  %v1471_v58 = vmul.f32 %v1338_v7, %v3538_v57 }
 0x2af   : > { %v1376_v14 = vpop.f32.mrf.mxu2 }
 0x2b0   : > { %v1340_v18 = vpop.f32.mrf.mxu0  ;;  %v1359_v21 = vpop.f32.mrf.mxu1 }
 0x2b1   : > { %v1476_v23 = vmul.f32 %v1340_v18, %v3509_v19  ;;  %v1480_v24 = vmul.f32 %v1340_v18, %v3511_v12  ;;  %v3525_v25 = vmul.f32 %v1340_v18, %v3513_v13  ;;  %v1388_v35 = vpack.c.bf16 %v1359_v21, %v1357_v8  ;;  %v3559_v8 = vld [vmem:[#allocation8 + $0xa0] sm:$0xff] }
 0x2b2   : > { %v1472_v6 = vmul.f32 %v1340_v18, %v3535_v55  ;;  %v3570_v21 = vld [vmem:[#allocation8 + $0xc0] sm:$0xff] }
 0x2b3   : > { %v1489_v26 = vpack.c.bf16 %v1476_v23, %v1475_v15  ;;  %v1491_v27 = vpack.c.bf16 %v1480_v24, %v3517_v17  ;;  %v1493_v28 = vpack.c.bf16 %v3525_v25, %v3520_v22  ;;  %v3572_v23 = vld [vmem:[#allocation8 + $0xb8] sm:$0xff]  ;;  %v352_v22 = vld [vmem:[#allocation8 + $0xd0] sm:$0xff] }
 0x2b4   : > { %v1487_v59 = vpack.c.bf16 %v1472_v6, %v1471_v58  ;;  %v358_v6 = vld [vmem:[#allocation8 + $0x100] sm:$0xff] }
 0x2b7   : > { %v1378_v29 = vpop.f32.mrf.mxu2 }
 0x2b8   : > { %v1362_v30 = vpop.f32.mrf.mxu1  ;;  %v1389_v39 = vpack.c.bf16 %v1378_v29, %v1376_v14  ;;  %v1343_v41 = vpop.f32.mrf.mxu0  ;;  %v3561_v14 = vld [vmem:[#allocation8 + $0x98] sm:$0xff]  ;;  %v351_v29 = vld [vmem:[#allocation8 + $0xc8] sm:$0xff] }
 0x2b9   : > { %v1473_v0 = vmul.f32 %v1343_v41, %v3545_v61  ;;  %v1477_v5 = vmul.f32 %v1343_v41, %v3553_v3  ;;  %v1481_v17 = vmul.f32 %v1343_v41, %v3561_v14 }
 0x2bf   : > { %v1381_v31 = vpop.f32.mrf.mxu2 }
 0x2c0   : > { %v1364_v32 = vpop.f32.mrf.mxu1  ;;  %v1345_v42 = vpop.f32.mrf.mxu0 }
 0x2c1   : > { %v1390_v34 = vpack.c.bf16 %v1364_v32, %v1362_v30  ;;  %v1474_v63 = vmul.f32 %v1345_v42, %v3543_v60  ;;  %v1478_v4 = vmul.f32 %v1345_v42, %v3551_v11  ;;  %v1482_v15 = vmul.f32 %v1345_v42, %v3559_v8 }
 0x2c2   : > { %v1486_v24 = vmul.f32 %v1345_v42, %v3570_v21 }
 0x2c3   : > { %1427 = vmatpush.bf16.msrb.mxu3 %v1390_v34  ;;  %v1488_v2 = vpack.c.bf16 %v1474_v63, %v1473_v0  ;;  %v1490_v7 = vpack.c.bf16 %v1478_v4, %v1477_v5  ;;  %v1492_v18 = vpack.c.bf16 %v1482_v15, %v1481_v17  ;;  %v359_v0 = vld [vmem:[#allocation8 + $0x108] sm:$0xff] }
 0x2c7   : > { %v1383_v36 = vpop.f32.mrf.mxu2  ;;  %1428 = vmatpush.bf16.msrb.mxu3 %v1388_v35  ;;  %v353_v35 = vld [vmem:[#allocation8 + $0xd8] sm:$0xff] }
 0x2c8   : > { %v1391_v37 = vpack.c.bf16 %v1383_v36, %v1381_v31 }
 0x2ca   : > { %1452 = vmatpush.bf16.msra.mxu0 %v1391_v37  ;;  %2533 = vmatmul.msk.bf16.vlgmr.msrb.gmra.mxu3 %vm1408_vm14, %v1400_v38 }
 0x2ce   : > { %1453 = vmatpush.bf16.msra.mxu0 %v1389_v39  ;;  %v354_v39 = vld [vmem:[#allocation8 + $0xe0] sm:$0xff] }
 0x2d1   : > { %2537 = vmatmul.msk.bf16.vlgmr.msra.gmra.mxu0 %vm1408_vm14, %v1400_v38 }
 0x2da   : > { %2534 = vmatmul.msk.bf16.gmra.mxu3 %vm1408_vm14, %v1401_v40 }
 0x2e1   : > { %2538 = vmatmul.msk.bf16.gmra.mxu0 %vm1408_vm14, %v1401_v40 }
 0x34d   : > { %v1430_v43 = vpop.f32.mrf.mxu3 }
 0x34e   : > { %v1455_v44 = vpop.f32.mrf.mxu0 }
 0x355   : > { %v1432_v1 = vpop.f32.mrf.mxu3 }
 0x356   : > { %v1456_v46 = vpop.f32.mrf.mxu0  ;;  %v1495_v53 = vpack.c.bf16 %v1432_v1, %v1430_v43  ;;  %v355_v43 = vld [vmem:[#allocation8 + $0xe8] sm:$0xff] }
 0x358   : > { %v1522_v56 = vsel %vm1128_vm0, %v1495_v53, 0 }
 0x35d   : > { %v1435_v47 = vpop.f32.mrf.mxu3 }
 0x35e   : > { %v1458_v48 = vpop.f32.mrf.mxu0 }
 0x365   : > { %v1437_v49 = vpop.f32.mrf.mxu3 }
 0x366   : > { %v1459_v50 = vpop.f32.mrf.mxu0  ;;  %v1496_v51 = vpack.c.bf16 %v1437_v49, %v1435_v47  ;;  %v356_v47 = vld [vmem:[#allocation8 + $0xf0] sm:$0xff] }
 0x368   : > { %v1525_v52 = vsel %vm1128_vm0, %v1496_v51, 0  ;;  %v357_v51 = vld [vmem:[#allocation8 + $0xf8] sm:$0xff] }
 0x369   : > { %1533 = vmatpush.bf16.xpose.msra.mxu1 %v1525_v52 }
 0x371   : > { %1534 = vmatpush.bf16.xpose.msra.mxu1 %v1522_v56 }
 0x378   : > { %2541 = vmatmul.msk.bf16.vlgmr.msra.gmra.mxu1 %vm1128_vm0, %v1487_v59 }
 0x388   : > { %2542 = vmatmul.msk.bf16.gmra.mxu1 %vm1128_vm0, %v1488_v2 }
 0x398   : > { %2543 = vmatmul.msk.bf16.gmra.mxu1 %vm1128_vm0, %v1489_v26  ;;  %v1485_v26 = vmul.f32 %v1343_v41, %v3572_v23 }
 0x3a8   : > { %2544 = vmatmul.msk.bf16.gmra.mxu1 %vm1128_vm0, %v1490_v7  ;;  %v1402_v7 = vpop.trf.xlu0 }
 0x3a9   : > { %2539 = vmatmul.msk.bf16.gmra.mxu0 %vm1408_vm14, %v1402_v7  ;;  %2535 = vmatmul.msk.bf16.gmra.mxu3 %vm1408_vm14, %v1402_v7 }
 0x3b0   : > { %v1403_v15 = vpop.trf.xlu0 }
 0x3b8   : > { %2545 = vmatmul.msk.bf16.gmra.mxu1 %vm1128_vm0, %v1491_v27  ;;  %v1494_v27 = vpack.c.bf16 %v1486_v24, %v1485_v26 }
 0x3b9   : > { %2540 = vmatmul.msk.bf16.gmra.mxu0 %vm1408_vm14, %v1403_v15  ;;  %2536 = vmatmul.msk.bf16.gmra.mxu3 %vm1408_vm14, %v1403_v15 }
 0x3c8   : > { %2546 = vmatmul.msk.bf16.gmra.mxu1 %vm1128_vm0, %v1492_v18 }
 0x3d8   : > { %2547 = vmatmul.msk.bf16.gmra.mxu1 %vm1128_vm0, %v1493_v28 }
 0x3e8   : > { %2548 = vmatmul.msk.bf16.gmra.mxu1 %vm1128_vm0, %v1494_v27 }
 0x3f5   : > { %v1536_v30 = vpop.f32.mrf.mxu1 }
 0x3f6   : > { %v1537_v31 = vadd.f32 %v1536_v30, %v351_v29 }
 0x3f8   : > { %v1576_v32 = vsel %vm1408_vm14, %v1537_v31, -inf }
 0x3f9   : > { %1577 = vmax.xlane.f32.xlu1 %v1576_v32 }
 0x3fd   : > { %v1538_v25 = vpop.f32.mrf.mxu1 }
 0x3fe   : > { %v1539_v28 = vadd.f32 %v1538_v25, %v352_v22  ;;  %v360_v25 = vld [vmem:[#allocation8 + $0x110] sm:$0xff] }
 0x400   : > { %v1579_v34 = vsel %vm1408_vm14, %v1539_v28, -inf }
 0x401   : > { %1580 = vmax.xlane.f32.xlu1 %v1579_v34 }
 0x405   : > { %v1541_v36 = vpop.f32.mrf.mxu1 }
 0x406   : > { %v1542_v37 = vadd.f32 %v1541_v36, %v353_v35 }
 0x408   : > { %v1582_v38 = vsel %vm1408_vm14, %v1542_v37, -inf }
 0x409   : > { %1583 = vmax.xlane.f32.xlu1 %v1582_v38 }
 0x40d   : > { %v1543_v40 = vpop.f32.mrf.mxu1 }
 0x40e   : > { %v1544_v41 = vadd.f32 %v1543_v40, %v354_v39 }
 0x410   : > { %v1585_v42 = vsel %vm1408_vm14, %v1544_v41, -inf }
 0x411   : > { %1586 = vmax.xlane.f32.xlu2 %v1585_v42 }
 0x415   : > { %v1546_v44 = vpop.f32.mrf.mxu1 }
 0x416   : > { %v3581_v1 = vadd.f32 %v1546_v44, %v355_v43 }
 0x418   : > { %v1588_v46 = vsel %vm1408_vm14, %v3581_v1, -inf }
 0x419   : > { %1589 = vmax.xlane.f32.xlu1 %v1588_v46 }
 0x41d   : > { %v1548_v48 = vpop.f32.mrf.mxu1 }
 0x41e   : > { %v3585_v49 = vadd.f32 %v1548_v48, %v356_v47  ;;  %v361_v47 = vld [vmem:[#allocation8 + $0x118] sm:$0xff] }
 0x420   : > { %v1591_v50 = vsel %vm1408_vm14, %v3585_v49, -inf }
 0x421   : > { %1592 = vmax.xlane.f32.xlu1 %v1591_v50 }
 0x425   : > { %v1551_v52 = vpop.f32.mrf.mxu1 }
 0x426   : > { %v3589_v53 = vadd.f32 %v1551_v52, %v357_v51 }
 0x428   : > { %v1594_v56 = vsel %vm1408_vm14, %v3589_v53, -inf }
 0x429   : > { %1595 = vmax.xlane.f32.xlu1 %v1594_v56 }
 0x42d   : > { %v1553_v58 = vpop.f32.mrf.mxu1 }
 0x42e   : > { %v3593_v59 = vadd.f32 %v1553_v58, %v358_v6 }
 0x430   : > { %v1597_v63 = vsel %vm1408_vm14, %v3593_v59, -inf }
 0x431   : > { %1598 = vmax.xlane.f32.xlu1 %v1597_v63  ;;  %v362_v63 = vld [vmem:[#allocation8 + $0x120] sm:$0xff] }
 0x435   : > { %v1556_v2 = vpop.f32.mrf.mxu1 }
 0x436   : > { %v3597_v4 = vadd.f32 %v1556_v2, %v359_v0 }
 0x438   : > { %v1600_v5 = vsel %vm1408_vm14, %v3597_v4, -inf }
 0x439   : > { %1601 = vmax.xlane.f32.xlu2 %v1600_v5 }
 0x43d   : > { %v1558_v27 = vpop.f32.mrf.mxu1 }
 0x43e   : > { %v3609_v34 = vadd.f32 %v1558_v27, %v360_v25 }
 0x440   : > { %v1603_v40 = vsel %vm1408_vm14, %v3609_v34, -inf }
 0x46c   : > { %v1578_v17 = vpop.xlane.xlu1 %1577 }
 0x46d   : > { %v1624_v18 = vsub.f32 %v1537_v31, %v1578_v17  ;;  %v1561_v31 = vpop.f32.mrf.mxu1 }
 0x46e   : > { %v3621_v50 = vadd.f32 %v1561_v31, %v361_v47 }
 0x46f   : > { %v1640_v24 = vmul.f32 1.442695, %v1624_v18 }
 0x470   : > { %v1606_v58 = vsel %vm1408_vm14, %v3621_v50, -inf }
 0x471   : > { %2801 = vpow2.f32 %v1640_v24  ;;  %v363_v24 = vld [vmem:[#allocation8 + $0x128] sm:$0xff] }
 0x474   : > { %v1581_v26 = vpop.xlane.xlu1 %1580 }
 0x475   : > { %v1625_v29 = vsub.f32 %v1539_v28, %v1581_v26  ;;  %v1563_v48 = vpop.f32.mrf.mxu1 }
 0x476   : > { %v3630_v2 = vadd.f32 %v1563_v48, %v362_v63 }
 0x477   : > { %v3605_v30 = vpop.eup %2801  ;;  %v1642_v32 = vmul.f32 1.442695, %v1625_v29 }
 0x478   : > { %v1672_v22 = vsel %vm1408_vm14, %v3605_v30, 0.0  ;;  %v1609_v17 = vsel %vm1408_vm14, %v3630_v2, -inf }
 0x479   : > { %2803 = vpow2.f32 %v1642_v32  ;;  %1673 = vadd.xlane.f32.xlu1 %v1672_v22 }
 0x47c   : > { %v1584_v35 = vpop.xlane.xlu1 %1583 }
 0x47d   : > { %v1626_v36 = vsub.f32 %v1542_v37, %v1584_v35  ;;  %v1566_v0 = vpop.f32.mrf.mxu1 }
 0x47e   : > { %v3639_v26 = vadd.f32 %v1566_v0, %v363_v24 }
 0x47f   : > { %v3611_v38 = vpop.eup %2803  ;;  %v1644_v39 = vmul.f32 1.442695, %v1626_v36  ;;  %v364_v36 = vld [vmem:[#allocation8 + $0x130] sm:$0xff] }
 0x480   : > { %v1675_v28 = vsel %vm1408_vm14, %v3611_v38, 0.0  ;;  %v1612_v25 = vsel %vm1408_vm14, %v3639_v26, -inf }
 0x481   : > { %2805 = vpow2.f32 %v1644_v39  ;;  %1676 = vadd.xlane.f32.xlu0 %v1675_v28  ;;  %1604 = vmax.xlane.f32.xlu1 %v1603_v40 }
 0x484   : > { %v1587_v42 = vpop.xlane.xlu2 %1586 }
 0x485   : > { %v1627_v43 = vsub.f32 %v1544_v41, %v1587_v42  ;;  %v1568_v29 = vpop.f32.mrf.mxu1 }
 0x486   : > { %v3648_v31 = vadd.f32 %v1568_v29, %v364_v36 }
 0x487   : > { %v3617_v44 = vpop.eup %2805  ;;  %v1646_v46 = vmul.f32 1.442695, %v1627_v43 }
 0x488   : > { %v1678_v37 = vsel %vm1408_vm14, %v3617_v44, 0.0  ;;  %v1615_v43 = vsel %vm1408_vm14, %v3648_v31, -inf }
 0x489   : > { %2807 = vpow2.f32 %v1646_v46  ;;  %1679 = vadd.xlane.f32.xlu2 %v1678_v37  ;;  %v365_v37 = vld [vmem:[#allocation8 + $0x138] sm:$0xff] }
 0x48c   : > { %v1590_v51 = vpop.xlane.xlu1 %1589 }
 0x48d   : > { %v1628_v52 = vsub.f32 %v3581_v1, %v1590_v51 }
 0x48f   : > { %v3624_v56 = vpop.eup %2807  ;;  %v1648_v6 = vmul.f32 1.442695, %v1628_v52 }
 0x490   : > { %v1681_v41 = vsel %vm1408_vm14, %v3624_v56, 0.0 }
 0x491   : > { %2809 = vpow2.f32 %v1648_v6  ;;  %1682 = vadd.xlane.f32.xlu1 %v1681_v41  ;;  %1607 = vmax.xlane.f32.xlu2 %v1606_v58  ;;  %v366_v58 = vld [vmem:[#allocation8 + $0x140] sm:$0xff] }
 0x494   : > { %v1593_v5 = vpop.xlane.xlu1 %1592 }
 0x495   : > { %v1629_v7 = vsub.f32 %v3585_v49, %v1593_v5 }
 0x497   : > { %v3633_v1 = vpop.eup %2809  ;;  %v1650_v15 = vmul.f32 1.442695, %v1629_v7 }
 0x498   : > { %v1684_v18 = vsel %vm1408_vm14, %v3633_v1, 0.0 }
 0x499   : > { %2811 = vpow2.f32 %v1650_v15  ;;  %1610 = vmax.xlane.f32.xlu1 %v1609_v17  ;;  %1685 = vadd.xlane.f32.xlu2 %v1684_v18  ;;  %v1461_v15 = vpop.f32.mrf.mxu0  ;;  %v1440_v17 = vpop.f32.mrf.mxu3 }
 0x49c   : > { %v1596_v27 = vpop.xlane.xlu1 %1595 }
 0x49d   : > { %v1630_v32 = vsub.f32 %v3589_v53, %v1596_v27  ;;  %v1571_v53 = vpop.f32.mrf.mxu1 }
 0x49e   : > { %v3657_v47 = vadd.f32 %v1571_v53, %v365_v37 }
 0x49f   : > { %v3642_v49 = vpop.eup %2811  ;;  %v1652_v22 = vmul.f32 1.442695, %v1630_v32 }
 0x4a0   : > { %v1687_v35 = vsel %vm1408_vm14, %v3642_v49, 0.0  ;;  %v1618_v6 = vsel %vm1408_vm14, %v3657_v47, -inf }
 0x4a1   : > { %2813 = vpow2.f32 %v1652_v22  ;;  %1613 = vmax.xlane.f32.xlu2 %v1612_v25  ;;  %1688 = vadd.xlane.f32.xlu1 %v1687_v35  ;;  %v1463_v18 = vpop.f32.mrf.mxu0  ;;  %v1441_v24 = vpop.f32.mrf.mxu3 }
 0x4a2   : > { %v1760_v25 = vpack.c.bf16 %v1463_v18, %v1461_v15 }
 0x4a4   : > { %v1599_v39 = vpop.xlane.xlu1 %1598 }
 0x4a5   : > { %v1631_v28 = vsub.f32 %v3593_v59, %v1599_v39  ;;  %v1573_v63 = vpop.f32.mrf.mxu1 }
 0x4a6   : > { %v3666_v0 = vadd.f32 %v1573_v63, %v366_v58 }
 0x4a7   : > { %v3651_v40 = vpop.eup %2813  ;;  %v1654_v42 = vmul.f32 1.442695, %v1631_v28 }
 0x4a8   : > { %v1690_v46 = vsel %vm1408_vm14, %v3651_v40, 0.0  ;;  %v1621_v7 = vsel %vm1408_vm14, %v3666_v0, -inf }
 0x4a9   : > { %2815 = vpow2.f32 %v1654_v42  ;;  %1616 = vmax.xlane.f32.xlu1 %v1615_v43  ;;  %1691 = vadd.xlane.f32.xlu2 %v1690_v46  ;;  %v1466_v27 = vpop.f32.mrf.mxu0  ;;  %v1443_v29 = vpop.f32.mrf.mxu3 }
 0x4ac   : > { %v1602_v48 = vpop.xlane.xlu2 %1601 }
 0x4ad   : > { %v1632_v51 = vsub.f32 %v3597_v4, %v1602_v48 }
 0x4af   : > { %v3660_v59 = vpop.eup %2815  ;;  %v1656_v52 = vmul.f32 1.442695, %v1632_v51 }
 0x4b0   : > { %v1693_v41 = vsel %vm1408_vm14, %v3660_v59, 0.0 }
 0x4b1   : > { %2817 = vpow2.f32 %v1656_v52  ;;  %1619 = vmax.xlane.f32.xlu2 %v1618_v6  ;;  %1694 = vadd.xlane.f32.xlu1 %v1693_v41  ;;  %v1468_v32 = vpop.f32.mrf.mxu0  ;;  %v1444_v35 = vpop.f32.mrf.mxu3 }
 0x4b2   : > { %v1761_v22 = vpack.c.bf16 %v1468_v32, %v1466_v27 }
 0x4b4   : > { %1792 = vmatpush.bf16.msra.mxu2 %v1761_v22 }
 0x4b7   : > { %v3668_v5 = vpop.eup %2817 }
 0x4b8   : > { %v1696_v4 = vsel %vm1408_vm14, %v3668_v5, 0.0  ;;  %1793 = vmatpush.bf16.msra.mxu2 %v1760_v25 }
 0x4b9   : > { %1697 = vadd.xlane.f32.xlu2 %v1696_v4  ;;  %1622 = vmax.xlane.f32.xlu1 %v1621_v7 }
 0x4ec   : > { %v1674_v36 = vpop.xlane.xlu1 %1673 }
 0x4ed   : > { %2819 = vrcp.f32 %v1674_v36 }
 0x4f3   : > { %v2820_v43 = vpop.eup %2819 }
 0x4f4   : > { %v1677_v39 = vpop.xlane.xlu0 %1676  ;;  %v1605_v28 = vpop.xlane.xlu1 %1604  ;;  %v1736_v37 = vmul.f32 %v2820_v43, %v3605_v30 }
 0x4f5   : > { %2821 = vrcp.f32 %v1677_v39  ;;  %v1633_v53 = vsub.f32 %v3609_v34, %v1605_v28 }
 0x4f7   : > { %v1658_v42 = vmul.f32 1.442695, %v1633_v53 }
 0x4f9   : > { %2823 = vpow2.f32 %v1658_v42 }
 0x4fb   : > { %v2822_v46 = vpop.eup %2821 }
 0x4fc   : > { %v1737_v48 = vmul.f32 %v2822_v46, %v3611_v38  ;;  %v1680_v51 = vpop.xlane.xlu2 %1679 }
 0x4fd   : > { %2825 = vrcp.f32 %v1680_v51 }
 0x4fe   : > { %v1752_v52 = vpack.c.bf16 %v1737_v48, %v1736_v37 }
 0x4ff   : > { %v3677_v6 = vpop.eup %2823 }
 0x500   : > { %2549 = vmatmul.msk.bf16.vlgmr.msra.gmra.mxu2 %vm1408_vm14, %v1752_v52  ;;  %v1699_v41 = vsel %vm1408_vm14, %v3677_v6, 0.0 }
 0x501   : > { %1700 = vadd.xlane.f32.xlu1 %v1699_v41 }
 0x503   : > { %v2826_v30 = vpop.eup %2825 }
 0x504   : > { %v1608_v34 = vpop.xlane.xlu2 %1607  ;;  %v1683_v58 = vpop.xlane.xlu1 %1682  ;;  %v1738_v17 = vmul.f32 %v2826_v30, %v3617_v44 }
 0x505   : > { %v1634_v63 = vsub.f32 %v3621_v50, %v1608_v34  ;;  %2827 = vrcp.f32 %v1683_v58 }
 0x507   : > { %v1660_v4 = vmul.f32 1.442695, %v1634_v63 }
 0x509   : > { %2829 = vpow2.f32 %v1660_v4 }
 0x50b   : > { %v2828_v38 = vpop.eup %2827 }
 0x50c   : > { %v1686_v7 = vpop.xlane.xlu2 %1685  ;;  %v1611_v15 = vpop.xlane.xlu1 %1610  ;;  %v1739_v18 = vmul.f32 %v2828_v38, %v3624_v56 }
 0x50d   : > { %v1635_v24 = vsub.f32 %v3630_v2, %v1611_v15 }
 0x50e   : > { %v1753_v27 = vpack.c.bf16 %v1739_v18, %v1738_v17 }
 0x50f   : > { %v3686_v29 = vpop.eup %2829  ;;  %v1662_v32 = vmul.f32 1.442695, %v1635_v24 }
 0x510   : > { %2550 = vmatmul.msk.bf16.gmra.mxu2 %vm1408_vm14, %v1753_v27  ;;  %v1702_v50 = vsel %vm1408_vm14, %v3686_v29, 0.0 }
 0x511   : > { %2831 = vpow2.f32 %v1662_v32  ;;  %1703 = vadd.xlane.f32.xlu2 %v1702_v50 }
 0x512   : > { %2833 = vrcp.f32 %v1686_v7 }
 0x514   : > { %v1614_v22 = vpop.xlane.xlu2 %1613  ;;  %v1689_v25 = vpop.xlane.xlu1 %1688 }
 0x515   : > { %v1636_v44 = vsub.f32 %v3639_v26, %v1614_v22  ;;  %2835 = vrcp.f32 %v1689_v25 }
 0x517   : > { %v3692_v56 = vpop.eup %2831  ;;  %v1664_v2 = vmul.f32 1.442695, %v1636_v44 }
 0x518   : > { %v1705_v35 = vsel %vm1408_vm14, %v3692_v56, 0.0  ;;  %v2834_v36 = vpop.eup %2833 }
 0x519   : > { %2837 = vpow2.f32 %v1664_v2  ;;  %1706 = vadd.xlane.f32.xlu1 %v1705_v35  ;;  %v1740_v42 = vmul.f32 %v2834_v36, %v3633_v1 }
 0x51b   : > { %v2836_v39 = vpop.eup %2835 }
 0x51c   : > { %v1692_v28 = vpop.xlane.xlu2 %1691  ;;  %v1617_v53 = vpop.xlane.xlu1 %1616  ;;  %v1741_v43 = vmul.f32 %v2836_v39, %v3642_v49 }
 0x51d   : > { %v1637_v46 = vsub.f32 %v3648_v31, %v1617_v53 }
 0x51e   : > { %v1754_v26 = vpack.c.bf16 %v1741_v43, %v1740_v42 }
 0x51f   : > { %v3699_v37 = vpop.eup %2837  ;;  %v1666_v48 = vmul.f32 1.442695, %v1637_v46 }
 0x520   : > { %2551 = vmatmul.msk.bf16.gmra.mxu2 %vm1408_vm14, %v1754_v26  ;;  %v1708_v51 = vsel %vm1408_vm14, %v3699_v37, 0.0 }
 0x521   : > { %2839 = vpow2.f32 %v1666_v48  ;;  %1709 = vadd.xlane.f32.xlu2 %v1708_v51 }
 0x522   : > { %2841 = vrcp.f32 %v1692_v28 }
 0x524   : > { %v1620_v52 = vpop.xlane.xlu2 %1619  ;;  %v1695_v41 = vpop.xlane.xlu1 %1694 }
 0x525   : > { %v1638_v1 = vsub.f32 %v3657_v47, %v1620_v52  ;;  %2843 = vrcp.f32 %v1695_v41 }
 0x527   : > { %v2840_v49 = vpop.eup %2839  ;;  %v1668_v34 = vmul.f32 1.442695, %v1638_v1 }
 0x528   : > { %v1711_v31 = vsel %vm1408_vm14, %v2840_v49, 0.0  ;;  %v2842_v58 = vpop.eup %2841 }
 0x529   : > { %2845 = vpow2.f32 %v1668_v34  ;;  %1712 = vadd.xlane.f32.xlu1 %v1711_v31  ;;  %v1742_v30 = vmul.f32 %v2842_v58, %v3651_v40 }
 0x52b   : > { %v2844_v63 = vpop.eup %2843 }
 0x52c   : > { %v1623_v4 = vpop.xlane.xlu1 %1622  ;;  %v1743_v38 = vmul.f32 %v2844_v63, %v3660_v59  ;;  %v1698_v32 = vpop.xlane.xlu2 %1697 }
 0x52d   : > { %v1639_v7 = vsub.f32 %v3666_v0, %v1623_v4 }
 0x52e   : > { %v1755_v15 = vpack.c.bf16 %v1743_v38, %v1742_v30 }
 0x52f   : > { %v2846_v17 = vpop.eup %2845  ;;  %v1670_v18 = vmul.f32 1.442695, %v1639_v7 }
 0x530   : > { %2552 = vmatmul.msk.bf16.gmra.mxu2 %vm1408_vm14, %v1755_v15  ;;  %v1714_v47 = vsel %vm1408_vm14, %v2846_v17, 0.0 }
 0x531   : > { %2847 = vpow2.f32 %v1670_v18  ;;  %1715 = vadd.xlane.f32.xlu2 %v1714_v47 }
 0x532   : > { %2849 = vrcp.f32 %v1698_v32  ;;  %v2693_v32 = vld [vmem:[#allocation5 + $0x18] sm:$0xff] }
 0x533   : > { %1908 = vmatpush.bf16.msra.mxu3 %v2693_v32  ;;  %v2695_v32 = vld [vmem:[#allocation7 + $0x8] sm:$0xff] }
 0x537   : > { %v2848_v24 = vpop.eup %2847 }
 0x538   : > { %v1717_v27 = vsel %vm1408_vm14, %v2848_v24, 0.0  ;;  %v2850_v59 = vpop.eup %2849 }
 0x539   : > { %1718 = vadd.xlane.f32.xlu1 %v1717_v27  ;;  %v1744_v0 = vmul.f32 %v2850_v59, %v3668_v5  ;;  %v2691_v59 = vld [vmem:[#allocation5 + $0x8] sm:$0xff] }
 0x574   : > { %v1701_v40 = vpop.xlane.xlu1 %1700 }
 0x575   : > { %2851 = vrcp.f32 %v1701_v40  ;;  %v2692_v40 = vld [vmem:[#allocation5 + $0x10] sm:$0xff] }
 0x576   : > { %1909 = vmatpush.bf16.msra.mxu3 %v2692_v40  ;;  %v2694_v40 = vld [vmem:[#allocation7] sm:$0xff] }
 0x57a   : > { %1910 = vmatpush.bf16.msra.mxu3 %v2691_v59 }
 0x57b   : > { %v2852_v50 = vpop.eup %2851 }
 0x57c   : > { %v1745_v22 = vmul.f32 %v2852_v50, %v3677_v6 }
 0x57e   : > { %v1756_v25 = vpack.c.bf16 %v1745_v22, %v1744_v0  ;;  %v2690_v0 = vld [vmem:[#allocation5] sm:$0xff] }
 0x57f   : > { %1911 = vmatpush.bf16.msra.mxu3 %v2690_v0 }
 0x580   : > { %2553 = vmatmul.msk.bf16.gmra.mxu2 %vm1408_vm14, %v1756_v25 }
 0x583   : > { %v1795_v44 = vpop.f32.mrf.mxu2 }
 0x584   : > { %v1704_v2 = vpop.xlane.xlu2 %1703  ;;  %v1835_v41 = vmul.f32 %v1795_v44, %v3538_v57 }
 0x585   : > { %2853 = vrcp.f32 %v1704_v2 }
 0x58b   : > { %v1797_v35 = vpop.f32.mrf.mxu2  ;;  %v2854_v39 = vpop.eup %2853 }
 0x58c   : > { %v1707_v36 = vpop.xlane.xlu1 %1706  ;;  %v1746_v42 = vmul.f32 %v2854_v39, %v3686_v29 }
 0x58d   : > { %2855 = vrcp.f32 %v1707_v36 }
 0x593   : > { %v2856_v28 = vpop.eup %2855  ;;  %v1800_v53 = vpop.f32.mrf.mxu2 }
 0x594   : > { %v1747_v43 = vmul.f32 %v2856_v28, %v3692_v56  ;;  %v1710_v5 = vpop.xlane.xlu2 %1709  ;;  %v1837_v15 = vmul.f32 %v1800_v53, %v3545_v61 }
 0x595   : > { %2857 = vrcp.f32 %v1710_v5 }
 0x596   : > { %v1757_v46 = vpack.c.bf16 %v1747_v43, %v1746_v42 }
 0x598   : > { %2554 = vmatmul.msk.bf16.gmra.mxu2 %vm1408_vm14, %v1757_v46 }
 0x59b   : > { %v1802_v6 = vpop.f32.mrf.mxu2  ;;  %v2858_v48 = vpop.eup %2857 }
 0x59c   : > { %v1713_v26 = vpop.xlane.xlu1 %1712  ;;  %v1748_v34 = vmul.f32 %v2858_v48, %v3699_v37 }
 0x59d   : > { %2859 = vrcp.f32 %v1713_v26 }
 0x5a3   : > { %v2860_v51 = vpop.eup %2859  ;;  %v1805_v52 = vpop.f32.mrf.mxu2 }
 0x5a4   : > { %v1839_v1 = vmul.f32 %v1805_v52, %v3503_v9  ;;  %v1749_v29 = vmul.f32 %v2860_v51, %v2840_v49  ;;  %v1716_v58 = vpop.xlane.xlu2 %1715 }
 0x5a5   : > { %2861 = vrcp.f32 %v1716_v58 }
 0x5a6   : > { %v1851_v31 = vadd.f32 %v1839_v1, %v1835_v41  ;;  %v1758_v56 = vpack.c.bf16 %v1749_v29, %v1748_v34 }
 0x5a8   : > { %2555 = vmatmul.msk.bf16.gmra.mxu2 %vm1408_vm14, %v1758_v56 }
 0x5ab   : > { %v1807_v63 = vpop.f32.mrf.mxu2  ;;  %v2862_v30 = vpop.eup %2861 }
 0x5ac   : > { %v1719_v4 = vpop.xlane.xlu1 %1718  ;;  %v1750_v9 = vmul.f32 %v2862_v30, %v2846_v17  ;;  %v1840_v17 = vmul.f32 %v1807_v63, %v3509_v19 }
 0x5ad   : > { %2863 = vrcp.f32 %v1719_v4 }
 0x5b3   : > { %v2864_v38 = vpop.eup %2863  ;;  %v1810_v7 = vpop.f32.mrf.mxu2 }
 0x5b4   : > { %v1841_v57 = vmul.f32 %v1810_v7, %v3553_v3  ;;  %v1751_v18 = vmul.f32 %v2864_v38, %v2848_v24  ;;  %v1836_v24 = vmul.f32 %v1797_v35, %v3535_v55  ;;  %v367_v38 = vld [vmem:[#allocation8 + $0x148] sm:$0xff] }
 0x5b6   : > { %v1853_v37 = vadd.f32 %v1841_v57, %v1837_v15  ;;  %v1759_v49 = vpack.c.bf16 %v1751_v18, %v1750_v9  ;;  %v1852_v2 = vadd.f32 %v1840_v17, %v1836_v24  ;;  %v1927_v15 = vpack.c.bf16 %v367_v38, %v367_v38 }
 0x5b8   : > { %2556 = vmatmul.msk.bf16.gmra.mxu2 %vm1408_vm14, %v1759_v49 }
 0x5bb   : > { %v1812_v47 = vpop.f32.mrf.mxu2 }
 0x5bc   : > { %v1842_v55 = vmul.f32 %v1812_v47, %v3551_v11  ;;  %v2697_v47 = vld [vmem:[#allocation7 + $0x18] sm:$0xff] }
 0x5bd   : > { %2017 = vmatpush.bf16.msrb.mxu3 %v2697_v47 }
 0x603   : > { %v1815_v27 = vpop.f32.mrf.mxu2 }
 0x604   : > { %v1843_v25 = vmul.f32 %v1815_v27, %v3505_v10  ;;  %v1838_v10 = vmul.f32 %v1802_v6, %v3543_v60  ;;  %v2788_v6 = vld [vmem:[#allocation8 + $0x2] ss:$0 sm:$0xff]  ;;  %v2696_v27 = vld [vmem:[#allocation7 + $0x10] sm:$0xff] }
 0x605   : > { %2018 = vmatpush.bf16.msrb.mxu3 %v2696_v27 }
 0x606   : > { %v1855_v28 = vadd.f32 %v1851_v31, %v1843_v25 }
 0x609   : > { %2019 = vmatpush.bf16.msrb.mxu3 %v2695_v32 }
 0x60b   : > { %v1817_v50 = vpop.f32.mrf.mxu2 }
 0x60c   : > { %v1844_v44 = vmul.f32 %v1817_v50, %v3511_v12 }
 0x60d   : > { %2020 = vmatpush.bf16.msrb.mxu3 %v2694_v40 }
 0x60e   : > { %v1856_v53 = vadd.f32 %v1852_v2, %v1844_v44 }
 0x61b   : > { %v1820_v61 = vpop.f32.mrf.mxu2 }
 0x61c   : > { %v1845_v12 = vmul.f32 %v1820_v61, %v3561_v14 }
 0x61e   : > { %v1857_v51 = vadd.f32 %v1853_v37, %v1845_v12 }
 0x623   : > { %v1822_v22 = vpop.f32.mrf.mxu2 }
 0x624   : > { %v1846_v35 = vmul.f32 %v1822_v22, %v3559_v8 }
 0x62b   : > { %v1825_v3 = vpop.f32.mrf.mxu2 }
 0x62c   : > { %v1847_v36 = vmul.f32 %v1825_v3, %v3507_v16  ;;  %v1854_v16 = vadd.f32 %v1842_v55, %v1838_v10 }
 0x62e   : > { %v1859_v43 = vadd.f32 %v1855_v28, %v1847_v36 }
 0x633   : > { %v1827_v39 = vpop.f32.mrf.mxu2 }
 0x634   : > { %v1848_v42 = vmul.f32 %v1827_v39, %v3513_v13  ;;  %v1858_v13 = vadd.f32 %v1854_v16, %v1846_v35 }
 0x636   : > { %v1860_v46 = vadd.f32 %v1856_v53, %v1848_v42  ;;  %v2790_v42 = vld [vmem:[#allocation8 + $0x3] ss:$0 sm:$0xff] }
 0x638   : > { %v1863_v5 = vpack.c.bf16 %v1860_v46, %v1859_v43 }
 0x63a   : > { %2573 = vmatmul.msk.bf16.vlgmr.msra.gmra.mxu3 %vm1128_vm0, %v1863_v5 }
 0x63b   : > { %v1830_v19 = vpop.f32.mrf.mxu2 }
 0x63c   : > { %v1849_v26 = vmul.f32 %v1830_v19, %v3572_v23 }
 0x63e   : > { %v1861_v41 = vadd.f32 %v1857_v51, %v1849_v26 }
 0x643   : > { %v1832_v48 = vpop.f32.mrf.mxu2 }
 0x644   : > { %v1850_v52 = vmul.f32 %v1832_v48, %v3570_v21 }
 0x646   : > { %v1862_v1 = vadd.f32 %v1858_v13, %v1850_v52 }
 0x648   : > { %v1864_v34 = vpack.c.bf16 %v1862_v1, %v1861_v41 }
 0x64a   : > { %2574 = vmatmul.msk.bf16.gmra.mxu3 %vm1128_vm0, %v1864_v34 }
 0x6bd   : > { %v1913_v11 = vpop.f32.mrf.mxu3 }
 0x6be   : > { %v1914_v58 = vadd.f32 %v2788_v6, %v1913_v11 }
 0x6c0   : > { %v1923_v30 = vadd.f32 %v1914_v58, %v3435_v20 }
 0x6c5   : > { %v1915_v29 = vpop.f32.mrf.mxu3 }
 0x6c6   : > { %v1916_v8 = vadd.f32 %v2788_v6, %v1915_v29 }
 0x6c8   : > { %v1924_v21 = vadd.f32 %v1916_v8, %v3439_v33 }
 0x6ca   : > { %v1928_v7 = vpack.c.bf16 %v1924_v21, %v1923_v30 }
 0x6cd   : > { %v1918_v60 = vpop.f32.mrf.mxu3 }
 0x6ce   : > { %v1919_v14 = vadd.f32 %v2788_v6, %v1918_v60 }
 0x6d0   : > { %v1925_v23 = vadd.f32 %v1919_v14, %v3443_v45  ;;  %v2789_v45 = vld [vmem:[#allocation8 + $0x1] ss:$0 sm:$0xff] }
 0x6d5   : > { %v1920_v31 = vpop.f32.mrf.mxu3 }
 0x6d6   : > { %v1921_v56 = vadd.f32 %v2788_v6, %v1920_v31 }
 0x6d8   : > { %v1926_v63 = vadd.f32 %v1921_v56, %v3447_v54 }
 0x6da   : > { %v1929_v4 = vpack.c.bf16 %v1926_v63, %v1925_v23 }
 0x6dc   : > { %1939 = vmatpush.bf16.msrb.mxu0 %v1929_v4 }
 0x6e0   : > { %1940 = vmatpush.bf16.msrb.mxu0 %v1928_v7 }
 0x6e3   : > { %2575 = vmatmul.msk.bf16.vlgmr.msrb.gmra.mxu0 %vm1408_vm14, %v1927_v15 }
 0x760   : > { %v1942_v57 = vpop.f32.mrf.mxu0 }
 0x761   : > { %v1946_v9 = vsel %vm1128_vm0, %v1942_v57, 0.0 }
 0x762   : > { %1947 = vadd.xlane.f32.xlu2 %v1946_v9 }
 0x768   : > { %v1944_v18 = vpop.f32.mrf.mxu0 }
 0x77a   : > { %1971 = vrot.lane.b32.xlu2 %v2789_v45, %s3074_s14 }
 0x7d5   : > { %v1948_v54 = vpop.xlane.xlu2 %1947 }
 0x7d6   : > { %v1949_v33 = vmul.f32 %v1948_v54, %v3451_v62 }
 0x7d8   : > { %v1950_v37 = vsub.f32 %v1942_v57, %v1949_v33 }
 0x7da   : > { %v1951_v20 = vmul.f32 %v1950_v37, %v1950_v37 }
 0x7dc   : > { %v1952_v49 = vsel %vm1128_vm0, %v1951_v20, 0.0 }
 0x7dd   : > { %1953 = vadd.xlane.f32.xlu1 %v1952_v49  ;;  %v1972_v36 = vpop.permute.xlu2 %1971 }
 0x850   : > { %v1954_v59 = vpop.xlane.xlu1 %1953 }
 0x851   : > { %v1955_v50 = vmul.f32 %v1954_v59, %v3451_v62 }
 0x853   : > { %v1956_v0 = vadd.f32 1e-05, %v1955_v50 }
 0x855   : > { %2865 = vrsqrt.f32 %v1956_v0  ;;  %vm1963_vm1 = vweird.f32 %v1956_v0 }
 0x85b   : > { %v2866_v61 = vpop.eup %2865 }
 0x85c   : > { %v1958_v22 = vmul.f32 %v2866_v61, %v1956_v0  ;;  %vm1964_vm15 = vweird.f32 %v2866_v61 }
 0x85d   : > { %vm1965_vm2 = vmor %vm1963_vm1, %vm1964_vm15 }
 0x85e   : > { %v1959_v3 = vmul.f32 %v2866_v61, %v1958_v22 }
 0x860   : > { %v1960_v17 = vmul.f32 0.5, %v1959_v3 }
 0x862   : > { %v1961_v24 = vsub.f32 1.5, %v1960_v17 }
 0x864   : > { %v1962_v25 = vmul.f32 %v2866_v61, %v1961_v24 }
 0x866   : > { %v1966_v44 = vsel %vm1965_vm2, %v2866_v61, %v1962_v25 }
 0x867   : > { %v1967_v2 = vmul.f32 %v1966_v44, %v1950_v37 }
 0x869   : > { %v1969_v39 = vmul.f32 %v2789_v45, %v1967_v2 }
 0x86b   : > { %v1974_v28 = vadd.f32 %v1972_v36, %v1969_v39 }
 0x86d   : > { %v1975_v53 = vmax.f32 %v1974_v28, 0.0 }
 0x86f   : > { %v1976_v62 = vpack.c.bf16 %v1975_v53, %v1975_v53 }
 0x871   : > { %2592 = vmatmul.msk.bf16.vlgmr.msrb.gmra.mxu3 %vm1128_vm0, %v1976_v62 }
 0x8f4   : > { %v2022_v43 = vpop.f32.mrf.mxu3 }
 0x8f5   : > { %v2023_v46 = vadd.f32 %v2790_v42, %v2022_v43 }
 0x8f7   : > { %2026 = vst [vmem:[%s314_s11] sm:$0xff] %v2023_v46 }
 0x8f8   : > { %3014 = shalt.err (!%p3011_p8)
}
 0x8f9   : > { %2714 = dma.vmem_to_hbm [thread:$0]  (%p3148_p5), %s2041_s16, 128, %s2043_s17, %s2028_s12  }
 0x8fc   : > { %v2024_v5 = vpop.f32.mrf.mxu3 }
 0x8fd PF: > { %p2741_p9 = scmp.ge.s32.totalorder %s3061_s24, 2  ;;  %s2054_s30 = sand.u32 1, %s3049_s21  }
 0x8fe   : > { %s2055_s9 = scalar_lea.sflag [#allocation4], %s2054_s30 }
 0x8ff   : > { %p2730_p10 = pnand %p2741_p9, %p3152_p6 }
 0x901   : > { %p2731_p11 = pneg %p2730_p10 }
 0x903   : > { %3044 = dma.done.wait (%p2731_p11), %s2055_s9, 128  }
 0x904   : > { %3046 = vsyncadd (%p2731_p11), %s2055_s9, 4294967168  ;;  %s3800_s14 = sld [smem:[#allocation15_spill]]  ;;  %p19_p12 = scmp.ge.s32.totalorder %s3135_s27, 4  }
 0x905   : > { %s3801_s23 = sld [smem:[#allocation16_spill]]  ;;  %s3802_s21 = smov %s3053_s22 }
 0x906   : > { %s3804_s24 = smov %s3135_s27  ;;  %21 = sbr.rel (!%p19_p12) target bundleno = 9 (0x9), region = 96 }
 0x90a   : > { %s3803_s22 = smov %s3800_s14 }
 0x90b   :  { %2061 = vsyncpa [#allocation3], 1 }
 0x90c   :  { %2063 = vsyncpa [#allocation3 + $0x1], 1 }
 0x90d   :  { %2064 = vsyncpa [#allocation6], 1 }
 0x90e   :  { %2065 = vsyncpa [#allocation9], 1 }
 0x90f   :  { %2066 = vsyncpa [#allocation4], 1 }
 0x910   :  { %2068 = vsyncpa [#allocation4 + $0x1], 1 }

</bundles_post_ra>
